<compile_context>
chip_gen: v6e
topology: v6e:2x2x1
jax: 0.10.0
libtpu: 0.0.40
codegen_flags: <defaults>
</compile_context>

<pallas_src>
import functools
from dataclasses import dataclass

import numpy as np
import jax
import jax.numpy as jnp
from jax import lax
from jax.experimental import pallas as pl
from jax.experimental.pallas import tpu as pltpu


ACT_DTYPE = jnp.bfloat16   # storage / MXU dtype for torso activations & weights
CH_PAD = 16                # channel rows padded to the bf16 sublane tile (aligned stores)
MAX_TM = 8192              # cap on output lanes per grid step (VMEM budget)


def _round_up(x, m):
    return (x + m - 1) // m * m


# ----------------------------------------------------------------------------
# Guarded flat layout: (Cp, S) with S = G + Mp_round + G,
# Mp = N*(D+2)*(H+2)*(W+2) (zero-padded NDHW flattened), G = one tile per side.
# ----------------------------------------------------------------------------
@dataclass(frozen=True)
class FlatLayout:
    N: int
    D: int
    H: int
    W: int
    Mp: int          # flattened zero-padded volume size
    dspan: int       # max |conv tap offset| in flat coords
    dspan_r: int     # dspan rounded up to 128 lanes (halo width)
    tm: int          # output lanes per grid step (resolution dependent)
    G: int           # guard columns each side (= tm)
    Mp_round: int    # Mp rounded up to tm
    S: int           # G + Mp_round + G
    n_data: int      # number of data tiles (= grid size)
    deltas: tuple    # 27 static lane offsets of the 3x3x3 taps


def make_layout(N, D, H, W):
    Mp = N * (D + 2) * (H + 2) * (W + 2)
    dspan = (H + 2) * (W + 2) + (W + 2) + 1
    dspan_r = _round_up(dspan, 128)
    # Resolution-dependent tile width: large enough that the 2*dspan_r halo is a
    # small fraction of the tile, >= dspan_r (so one neighbour block covers the
    # halo), capped for VMEM.  Guard width G = exactly one tile per side so the
    # halo BlockSpecs can use block indices i-1 / i / i+1.
    tm = max(4 * dspan_r, 512)
    tm = min(tm, _round_up(Mp, 128))
    tm = min(tm, MAX_TM)
    tm = max(tm, dspan_r)
    tm = _round_up(tm, 128)
    G = tm
    Mp_round = _round_up(Mp, tm)
    S = G + Mp_round + G
    deltas = tuple((kd - 1) * (H + 2) * (W + 2) + (kh - 1) * (W + 2) + (kw - 1)
                   for kd in range(3) for kh in range(3) for kw in range(3))
    return FlatLayout(N, D, H, W, Mp, dspan, dspan_r, tm, G, Mp_round, S,
                      Mp_round // tm, deltas)


def make_mask(lay):
    """(1, S) f32 mask: 1.0 at interior voxels, 0.0 at conv padding / guards / rounding."""
    inter = np.zeros((lay.N, lay.D + 2, lay.H + 2, lay.W + 2), np.float32)
    inter[:, 1:-1, 1:-1, 1:-1] = 1.0
    m = np.zeros((1, lay.S), np.float32)
    m[0, lay.G:lay.G + lay.Mp] = inter.reshape(-1)
    return jnp.asarray(m)


def to_flat(x, lay, dtype=ACT_DTYPE):
    """(N, D, H, W, C) channels-last -> guarded flat (Cp, S); channel rows padded to CH_PAD."""
    N, D, H, W, C = x.shape
    Cp = _round_up(C, CH_PAD)
    xp = jnp.pad(x, ((0, 0), (1, 1), (1, 1), (1, 1), (0, 0)))
    flat = jnp.transpose(xp, (4, 0, 1, 2, 3)).reshape(C, lay.Mp)
    flat = jnp.pad(flat, ((0, Cp - C), (lay.G, lay.S - lay.G - lay.Mp)))
    return flat.astype(dtype)


def from_flat(a, lay, C):
    """Guarded flat (Cp, S) -> (N, D, H, W, C) channels-last (guards / pad rows dropped)."""
    v = a[:C, lay.G:lay.G + lay.Mp].reshape(C, lay.N, lay.D + 2, lay.H + 2, lay.W + 2)
    v = v[:, :, 1:-1, 1:-1, 1:-1]
    return jnp.transpose(v, (1, 2, 3, 4, 0))


def pixel_shuffle_3d_cl(x, r=2):
    """pixel_shuffle_3d in channels-last layout (matches torch channel ordering:
    c = c_out*r^3 + s1*r^2 + s2*r + s3 with (s1, s2, s3) -> (D, H, W) offsets)."""
    N, D, H, W, C8 = x.shape
    C = C8 // (r ** 3)
    x = x.reshape(N, D, H, W, C, r, r, r)
    x = jnp.transpose(x, (0, 1, 5, 2, 6, 3, 7, 4))   # N, D, r1, H, r2, W, r3, C
    return x.reshape(N, D * r, H * r, W * r, C)


# ----------------------------------------------------------------------------
# Fused conv kernel: [LN+SiLU prologue] -> im2col -> single big-K MXU matmul
#                    -> [+bias, +residual, *mask] epilogue
# ----------------------------------------------------------------------------
def _make_conv_kernel(*, cin_p, cin, cout_p, tm, dspan_r, deltas, apply_ln, has_res):
    def kernel(*refs):
        it = iter(refs)
        xl = next(it)            # (cin_p, tm)  left-neighbour block (halo source)
        xc = next(it)            # (cin_p, tm)  centre block
        xr = next(it)            # (cin_p, tm)  right-neighbour block (halo source)
        ml = next(it)            # (1, tm) f32  pad masks, same 3 blocks
        mc = next(it)
        mr = next(it)
        w_ref = next(it)         # (cout_p, 27*cin_p) bf16 folded weight (resident)
        b_ref = next(it)         # (cout_p, 1) f32
        g_ref = be_ref = r_ref = None
        if apply_ln:
            g_ref = next(it)     # (cin_p, 1) f32 (zero in padded rows)
            be_ref = next(it)    # (cin_p, 1) f32 (zero in padded rows)
        if has_res:
            r_ref = next(it)     # (cout_p, tm) residual tile
        o_ref = next(it)         # (cout_p, tm) output tile
        slab = next(it)          # (cin_p, tm + 2*dspan_r) activated halo slab (scratch)
        col = next(it)           # (27*cin_p, tm) im2col slab (scratch)

        def ln_silu(x, m):
            # ChannelLayerNorm32 (fp32, biased variance over the TRUE channel count,
            # eps=1e-5) + SiLU.  Garbage (guard) columns are zeroed via where() before
            # any arithmetic so NaN/Inf bit patterns cannot propagate; the result is
            # re-zeroed at pad/guard columns afterwards (LN(0) != 0).
            xs = jnp.where(m > 0.0, x.astype(jnp.float32), 0.0)
            mu = jnp.mean(xs[:cin], axis=0, keepdims=True)
            xc0 = xs[:cin] - mu
            var = jnp.mean(xc0 * xc0, axis=0, keepdims=True)
            y = (xs - mu) * lax.rsqrt(var + 1e-5) * g_ref[...] + be_ref[...]
            act = y * jax.nn.sigmoid(y)
            return jnp.where(m > 0.0, act, 0.0)

        def clean(x, m):
            # Zero out-of-volume columns without arithmetic on (possibly garbage) data.
            return jnp.where(m > 0.0, x, jnp.zeros_like(x))

        # ---- prologue: build the activated halo slab ------------------------------
        if apply_ln:
            slab[:, :dspan_r] = ln_silu(xl[:, tm - dspan_r:],
                                        ml[:, tm - dspan_r:]).astype(slab.dtype)
            slab[:, dspan_r:dspan_r + tm] = ln_silu(xc[...], mc[...]).astype(slab.dtype)
            slab[:, dspan_r + tm:] = ln_silu(xr[:, :dspan_r],
                                             mr[:, :dspan_r]).astype(slab.dtype)
        else:
            # Centre data blocks already have exact zeros at pad columns (producer
            # epilogue / to_flat); only the halo edges may touch unwritten guards.
            slab[:, :dspan_r] = clean(xl[:, tm - dspan_r:], ml[:, tm - dspan_r:])
            slab[:, dspan_r:dspan_r + tm] = xc[...]
            slab[:, dspan_r + tm:] = clean(xr[:, :dspan_r], mr[:, :dspan_r])

        # ---- im2col: 27 statically lane-shifted copies stacked on sublanes --------
        # (cin_p is a multiple of 16, so every store is bf16-tile aligned.)
        for t, d in enumerate(deltas):
            col[t * cin_p:(t + 1) * cin_p, :] = slab[:, dspan_r + d:dspan_r + d + tm]

        # ---- single big-K MXU matmul: (cout_p, 27*cin_p) x (27*cin_p, tm) ---------
        acc = jnp.dot(w_ref[...], col[...], preferred_element_type=jnp.float32)
        acc = acc + b_ref[...]
        if has_res:
            acc = acc + r_ref[...].astype(jnp.float32)
        acc = acc * mc[...]                 # zero conv-pad / rounding columns
        o_ref[...] = acc.astype(o_ref.dtype)

    return kernel


def _vmem_limit_bytes(cin_p, cout_p, tm, dspan_r, has_res, out_dtype):
    bf = 2
    out_sz = jnp.dtype(out_dtype).itemsize
    xblk = cin_p * tm * bf
    mblk = tm * 4
    wbytes = cout_p * 27 * cin_p * bf
    outblk = cout_p * tm * out_sz
    resblk = cout_p * tm * bf if has_res else 0
    slab = cin_p * (tm + 2 * dspan_r) * bf
    col = 27 * cin_p * tm * bf
    need = 2 * (3 * xblk + 3 * mblk + wbytes + cout_p * 4 + outblk + resblk) + slab + col
    return int(min(max(2 * need + (4 << 20), 24 << 20), 100 << 20))


def fused_conv3d(x_flat, mask_flat, w, b, lay, *, gamma=None, beta=None,
                 residual=None, out_dtype=ACT_DTYPE):
    """3x3x3 conv (stride 1, pad 1, cross-correlation like nn.Conv3d) on the guarded
    flat layout, with optional fused ChannelLayerNorm32+SiLU prologue and fused
    residual add + pad-mask in the epilogue.

    x_flat:   (cin_p, S)   mask_flat: (1, S) f32
    w:        (3, 3, 3, Cin, Cout)    b: (Cout,)
    returns   (cout_p, S).  NOTE: the two guard blocks of the result are never written
    (they are also never read unmasked -- halo reads are where()-masked in the kernel).
    """
    cin, cout = w.shape[3], w.shape[4]
    cin_p = _round_up(cin, CH_PAD)
    cout_p = _round_up(cout, CH_PAD)
    assert x_flat.shape == (cin_p, lay.S), (x_flat.shape, (cin_p, lay.S))
    apply_ln = gamma is not None
    has_res = residual is not None
    tm, dspan_r = lay.tm, lay.dspan_r

    # Fold the 27 taps into the contraction dim: (cout_p, 27*cin_p), zero-padded channels.
    wp = jnp.pad(w.astype(jnp.float32),
                 ((0, 0), (0, 0), (0, 0), (0, cin_p - cin), (0, cout_p - cout)))
    w_fold = jnp.transpose(wp.reshape(27, cin_p, cout_p), (2, 0, 1))
    w_fold = w_fold.reshape(cout_p, 27 * cin_p).astype(ACT_DTYPE)
    b2 = jnp.pad(b.astype(jnp.float32), (0, cout_p - cout)).reshape(cout_p, 1)

    inputs = [x_flat, x_flat, x_flat, mask_flat, mask_flat, mask_flat, w_fold, b2]
    in_specs = [
        pl.BlockSpec((cin_p, tm), lambda i: (0, i)),          # left neighbour (halo)
        pl.BlockSpec((cin_p, tm), lambda i: (0, i + 1)),      # centre tile
        pl.BlockSpec((cin_p, tm), lambda i: (0, i + 2)),      # right neighbour (halo)
        pl.BlockSpec((1, tm), lambda i: (0, i)),
        pl.BlockSpec((1, tm), lambda i: (0, i + 1)),
        pl.BlockSpec((1, tm), lambda i: (0, i + 2)),
        pl.BlockSpec((cout_p, 27 * cin_p), lambda i: (0, 0)),  # resident folded weight
        pl.BlockSpec((cout_p, 1), lambda i: (0, 0)),           # bias
    ]
    if apply_ln:
        gz = jnp.pad(gamma.astype(jnp.float32), (0, cin_p - cin)).reshape(cin_p, 1)
        bz = jnp.pad(beta.astype(jnp.float32), (0, cin_p - cin)).reshape(cin_p, 1)
        inputs += [gz, bz]
        in_specs += [pl.BlockSpec((cin_p, 1), lambda i: (0, 0)),
                     pl.BlockSpec((cin_p, 1), lambda i: (0, 0))]
    if has_res:
        inputs += [residual]
        in_specs += [pl.BlockSpec((cout_p, tm), lambda i: (0, i + 1))]

    kernel = _make_conv_kernel(cin_p=cin_p, cin=cin, cout_p=cout_p, tm=tm,
                               dspan_r=dspan_r, deltas=lay.deltas,
                               apply_ln=apply_ln, has_res=has_res)

    cost = pl.CostEstimate(
        flops=2 * cout_p * 27 * cin_p * lay.Mp_round,
        transcendentals=(lay.n_data * (tm + 2 * dspan_r) * cin_p) if apply_ln else 0,
        bytes_accessed=(3 * cin_p * lay.Mp_round * 2 + 3 * lay.Mp_round * 4
                        + cout_p * 27 * cin_p * 2
                        + cout_p * lay.Mp_round * jnp.dtype(out_dtype).itemsize
                        + (cout_p * lay.Mp_round * 2 if has_res else 0)))

    return pl.pallas_call(
        kernel,
        out_shape=jax.ShapeDtypeStruct((cout_p, lay.S), out_dtype),
        grid_spec=pltpu.PrefetchScalarGridSpec(
            num_scalar_prefetch=0,
            grid=(lay.n_data,),                 # data tiles only: no guard grid steps
            in_specs=in_specs,
            out_specs=pl.BlockSpec((cout_p, tm), lambda i: (0, i + 1)),
            scratch_shapes=[
                pltpu.VMEM((cin_p, tm + 2 * dspan_r), x_flat.dtype),  # activated halo slab
                pltpu.VMEM((27 * cin_p, tm), x_flat.dtype),           # im2col slab
            ]),
        compiler_params=pltpu.CompilerParams(
            dimension_semantics=("parallel",),
            vmem_limit_bytes=_vmem_limit_bytes(cin_p, cout_p, tm, dspan_r,
                                               has_res, out_dtype)),
        cost_estimate=cost,
    )(*inputs)


# ----------------------------------------------------------------------------
# Deterministic parameter construction (matches module shapes; NOT a checkpoint)
# ----------------------------------------------------------------------------
def conv_init(key, cin, cout):
    k1, k2 = jax.random.split(key)
    w = jax.random.normal(k1, (3, 3, 3, cin, cout), jnp.float32) * (0.2 / np.sqrt(27 * cin))
    b = jax.random.normal(k2, (cout,), jnp.float32) * 0.01
    # NOTE: conv2 of ResBlock3d is zero_module() in torch init; here we use
    # deterministic random weights so the kernels actually compute something.
    return w, b


def ln_init(key, c):
    k1, k2 = jax.random.split(key)
    g = 1.0 + 0.1 * jax.random.normal(k1, (c,), jnp.float32)
    b = 0.1 * jax.random.normal(k2, (c,), jnp.float32)
    return g, b


def res_init(key, ch):
    k1, k2, k3, k4 = jax.random.split(key, 4)
    return (ln_init(k1, ch), conv_init(k2, ch, ch),
            ln_init(k3, ch), conv_init(k4, ch, ch))


# ----------------------------------------------------------------------------
# Forward pass (mirrors SparseStructureDecoder.forward)
# ----------------------------------------------------------------------------
def resblock(p, h_flat, mask, lay):
    (g1, b1), (w1, c1), (g2, b2), (w2, c2) = p
    y = fused_conv3d(h_flat, mask, w1, c1, lay, gamma=g1, beta=b1)               # norm1+SiLU+conv1
    h = fused_conv3d(y, mask, w2, c2, lay, gamma=g2, beta=b2, residual=h_flat)   # norm2+SiLU+conv2+skip
    return h


def decoder_forward(params, x):
    N, D, H, W, _ = x.shape
    lay = make_layout(N, D, H, W)
    mask = make_mask(lay)
    h = to_flat(x, lay)

    w, b = params["input"]
    h = fused_conv3d(h, mask, w, b, lay)                 # input_layer

    for rp in params["middle"]:                          # middle_block
        h = resblock(rp, h, mask, lay)

    for kind, p in params["blocks"]:                     # blocks
        if kind == "res":
            h = resblock(p, h, mask, lay)
        else:                                            # UpsampleBlock3d, mode='conv'
            uw, ub = p
            h = fused_conv3d(h, mask, uw, ub, lay)
            c8 = uw.shape[-1]
            dense = from_flat(h, lay, c8)                # (N, D, H, W, ch*8)
            dense = pixel_shuffle_3d_cl(dense, 2)        # JAX glue: reshape/transpose
            N2, D2, H2, W2 = dense.shape[:4]
            lay = make_layout(N2, D2, H2, W2)
            mask = make_mask(lay)
            h = to_flat(dense, lay)

    (g, be), (ow, ob) = params["out"]                    # out_layer: norm + SiLU + conv
    h = fused_conv3d(h, mask, ow, ob, lay, gamma=g, beta=be, out_dtype=jnp.float32)
    return from_flat(h, lay, ow.shape[-1])


if __name__ == "__main__":
    # Small config consistent with the module:
    out_channels = 1
    latent_channels = 4
    num_res_blocks = 1
    channels = [16, 8]
    num_res_blocks_middle = 2
    N, R = 1, 8   # batch, latent spatial resolution (output resolution = 16)

    key = jax.random.PRNGKey(0)
    keys = iter(jax.random.split(key, 64))

    params = {
        "input": conv_init(next(keys), latent_channels, channels[0]),
        "middle": [res_init(next(keys), channels[0]) for _ in range(num_res_blocks_middle)],
    }
    blocks = []
    for i, ch in enumerate(channels):
        for _ in range(num_res_blocks):
            blocks.append(("res", res_init(next(keys), ch)))
        if i < len(channels) - 1:
            blocks.append(("up", conv_init(next(keys), ch, channels[i + 1] * 8)))
    params["blocks"] = blocks
    params["out"] = (ln_init(next(keys), channels[-1]),
                     conv_init(next(keys), channels[-1], out_channels))

    # input latent: channels-last (N, D, H, W, C_latent)
    x = jax.random.normal(next(keys), (N, R, R, R, latent_channels), jnp.float32)

    # --- sanity check 1: plain conv path vs lax.conv (same bf16 rounding) ----
    lay0 = make_layout(N, R, R, R)
    mask0 = make_mask(lay0)
    xf = to_flat(x, lay0)
    w_in, b_in = params["input"]
    got = from_flat(fused_conv3d(xf, mask0, w_in, b_in, lay0, out_dtype=jnp.float32),
                    lay0, channels[0])
    xr = x.astype(jnp.bfloat16).astype(jnp.float32)
    wr = w_in.astype(jnp.bfloat16).astype(jnp.float32)
    ref = lax.conv_general_dilated(
        xr, wr, (1, 1, 1), "SAME",
        dimension_numbers=("NDHWC", "DHWIO", "NDHWC")) + b_in
    np.testing.assert_allclose(np.asarray(got), np.asarray(ref), atol=1e-2, rtol=1e-2)

    # --- sanity check 2: fused LN+SiLU prologue + conv + residual epilogue ---
    h0 = fused_conv3d(xf, mask0, w_in, b_in, lay0)            # bf16 activation (16 rows)
    (g1, bb1), (wc1, bc1) = params["middle"][0][0], params["middle"][0][1]
    got2 = from_flat(
        fused_conv3d(h0, mask0, wc1, bc1, lay0, gamma=g1, beta=bb1,
                     residual=h0, out_dtype=jnp.float32), lay0, channels[0])
    hd = from_flat(h0, lay0, channels[0]).astype(jnp.float32)
    mu = hd.mean(-1, keepdims=True)
    var = ((hd - mu) ** 2).mean(-1, keepdims=True)
    yn = (hd - mu) * lax.rsqrt(var + 1e-5) * g1 + bb1
    a = (yn * jax.nn.sigmoid(yn)).astype(jnp.bfloat16).astype(jnp.float32)
    wr1 = wc1.astype(jnp.bfloat16).astype(jnp.float32)
    ref2 = lax.conv_general_dilated(
        a, wr1, (1, 1, 1), "SAME",
        dimension_numbers=("NDHWC", "DHWIO", "NDHWC")) + bc1 + hd
    np.testing.assert_allclose(np.asarray(got2), np.asarray(ref2), atol=3e-2, rtol=3e-2)

    # --- full decoder forward ------------------------------------------------
    fwd = jax.jit(functools.partial(decoder_forward, params))
    out = fwd(x)
    jax.block_until_ready(out)
    assert out.shape == (N, 2 * R, 2 * R, 2 * R, out_channels)
    print("KERNEL_OK")
</pallas_src>

<mosaic_0001>
module attributes {stable_mosaic.version = 11 : i64} {
  func.func @kernel(%arg0: i32, %arg1: memref<16x512xbf16, #tpu.memory_space<vmem>>, %arg2: memref<16x512xbf16, #tpu.memory_space<vmem>>, %arg3: memref<16x512xbf16, #tpu.memory_space<vmem>>, %arg4: memref<1x512xf32, #tpu.memory_space<vmem>>, %arg5: memref<1x512xf32, #tpu.memory_space<vmem>>, %arg6: memref<1x512xf32, #tpu.memory_space<vmem>>, %arg7: memref<16x432xbf16, #tpu.memory_space<vmem>>, %arg8: memref<16x1xf32, #tpu.memory_space<vmem>>, %arg9: memref<16x512xf32, #tpu.memory_space<vmem>>, %arg10: memref<16x768xbf16, #tpu.memory_space<vmem>>, %arg11: memref<432x512xbf16, #tpu.memory_space<vmem>>) attributes {dimension_semantics = [#tpu.dimension_semantics<parallel>], iteration_bounds = array<i64: 2>, scalar_prefetch = 0 : i64, scratch_operands = 2 : i64, tpu.core_type = #tpu.core_type<tc>, window_params = [{transform_indices = @transform_0, window_bounds = array<i64: 16, 512>}, {transform_indices = @transform_1, window_bounds = array<i64: 16, 512>}, {transform_indices = @transform_2, window_bounds = array<i64: 16, 512>}, {transform_indices = @transform_3, window_bounds = array<i64: 1, 512>}, {transform_indices = @transform_4, window_bounds = array<i64: 1, 512>}, {transform_indices = @transform_5, window_bounds = array<i64: 1, 512>}, {pipeline_mode = #tpu.pipeline_mode<synchronous>, transform_indices = @transform_6, window_bounds = array<i64: 16, 432>}, {pipeline_mode = #tpu.pipeline_mode<synchronous>, transform_indices = @transform_7, window_bounds = array<i64: 16, 1>}, {transform_indices = @transform_8, window_bounds = array<i64: 16, 512>}]} {
    %c0 = arith.constant 0 : index
    %c384 = arith.constant 384 : index
    %0 = vector.load %arg1[%c0, %c384] : memref<16x512xbf16, #tpu.memory_space<vmem>>, vector<16x128xbf16>
    %c0_0 = arith.constant 0 : index
    %c384_1 = arith.constant 384 : index
    %1 = vector.load %arg4[%c0_0, %c384_1] : memref<1x512xf32, #tpu.memory_space<vmem>>, vector<1x128xf32>
    %cst = arith.constant 0.000000e+00 : f32
    %2 = vector.broadcast %cst : f32 to vector<1x128xf32>
    %3 = arith.cmpf ogt, %1, %2 : vector<1x128xf32>
    %cst_2 = arith.constant 0.000000e+00 : bf16
    %4 = vector.broadcast %cst_2 : bf16 to vector<16x128xbf16>
    %5 = vector.shape_cast %3 : vector<1x128xi1> to vector<1x128xi1>
    %6 = vector.broadcast %5 : vector<1x128xi1> to vector<16x128xi1>
    %7 = arith.select %6, %0, %4 : vector<16x128xi1>, vector<16x128xbf16>
    %c0_3 = arith.constant 0 : index
    %c0_4 = arith.constant 0 : index
    %8 = vector.load %arg10[%c0_3, %c0_4] : memref<16x768xbf16, #tpu.memory_space<vmem>>, vector<16x128xbf16>
    tpu.vector_store %arg10[%c0_3, %c0_4], %7 {strides = array<i32>} : memref<16x768xbf16, #tpu.memory_space<vmem>>, vector<16x128xbf16>,
    %c0_5 = arith.constant 0 : index
    %c0_6 = arith.constant 0 : index
    %9 = vector.load %arg2[%c0_5, %c0_6] : memref<16x512xbf16, #tpu.memory_space<vmem>>, vector<16x512xbf16>
    %c0_7 = arith.constant 0 : index
    %c128 = arith.constant 128 : index
    %10 = vector.load %arg10[%c0_7, %c128] : memref<16x768xbf16, #tpu.memory_space<vmem>>, vector<16x512xbf16>
    tpu.vector_store %arg10[%c0_7, %c128], %9 {strides = array<i32>} : memref<16x768xbf16, #tpu.memory_space<vmem>>, vector<16x512xbf16>,
    %c0_8 = arith.constant 0 : index
    %c0_9 = arith.constant 0 : index
    %11 = vector.load %arg3[%c0_8, %c0_9] : memref<16x512xbf16, #tpu.memory_space<vmem>>, vector<16x128xbf16>
    %c0_10 = arith.constant 0 : index
    %c0_11 = arith.constant 0 : index
    %12 = vector.load %arg6[%c0_10, %c0_11] : memref<1x512xf32, #tpu.memory_space<vmem>>, vector<1x128xf32>
    %cst_12 = arith.constant 0.000000e+00 : f32
    %13 = vector.broadcast %cst_12 : f32 to vector<1x128xf32>
    %14 = arith.cmpf ogt, %12, %13 : vector<1x128xf32>
    %cst_13 = arith.constant 0.000000e+00 : bf16
    %15 = vector.broadcast %cst_13 : bf16 to vector<16x128xbf16>
    %16 = vector.shape_cast %14 : vector<1x128xi1> to vector<1x128xi1>
    %17 = vector.broadcast %16 : vector<1x128xi1> to vector<16x128xi1>
    %18 = arith.select %17, %11, %15 : vector<16x128xi1>, vector<16x128xbf16>
    %c0_14 = arith.constant 0 : index
    %c640 = arith.constant 640 : index
    %19 = vector.load %arg10[%c0_14, %c640] : memref<16x768xbf16, #tpu.memory_space<vmem>>, vector<16x128xbf16>
    tpu.vector_store %arg10[%c0_14, %c640], %18 {strides = array<i32>} : memref<16x768xbf16, #tpu.memory_space<vmem>>, vector<16x128xbf16>,
    %c0_15 = arith.constant 0 : index
    %c17 = arith.constant 17 : index
    %20 = vector.load %arg10[%c0_15, %c17] : memref<16x768xbf16, #tpu.memory_space<vmem>>, vector<16x512xbf16>
    %c0_16 = arith.constant 0 : index
    %c0_17 = arith.constant 0 : index
    %21 = vector.load %arg11[%c0_16, %c0_17] : memref<432x512xbf16, #tpu.memory_space<vmem>>, vector<16x512xbf16>
    tpu.vector_store %arg11[%c0_16, %c0_17], %20 {strides = array<i32>} : memref<432x512xbf16, #tpu.memory_space<vmem>>, vector<16x512xbf16>,
    %c0_18 = arith.constant 0 : index
    %c18 = arith.constant 18 : index
    %22 = vector.load %arg10[%c0_18, %c18] : memref<16x768xbf16, #tpu.memory_space<vmem>>, vector<16x512xbf16>
    %c16 = arith.constant 16 : index
    %c0_19 = arith.constant 0 : index
    %23 = vector.load %arg11[%c16, %c0_19] : memref<432x512xbf16, #tpu.memory_space<vmem>>, vector<16x512xbf16>
    tpu.vector_store %arg11[%c16, %c0_19], %22 {strides = array<i32>} : memref<432x512xbf16, #tpu.memory_space<vmem>>, vector<16x512xbf16>,
    %c0_20 = arith.constant 0 : index
    %c19 = arith.constant 19 : index
    %24 = vector.load %arg10[%c0_20, %c19] : memref<16x768xbf16, #tpu.memory_space<vmem>>, vector<16x512xbf16>
    %c32 = arith.constant 32 : index
    %c0_21 = arith.constant 0 : index
    %25 = vector.load %arg11[%c32, %c0_21] : memref<432x512xbf16, #tpu.memory_space<vmem>>, vector<16x512xbf16>
    tpu.vector_store %arg11[%c32, %c0_21], %24 {strides = array<i32>} : memref<432x512xbf16, #tpu.memory_space<vmem>>, vector<16x512xbf16>,
    %c0_22 = arith.constant 0 : index
    %c27 = arith.constant 27 : index
    %26 = vector.load %arg10[%c0_22, %c27] : memref<16x768xbf16, #tpu.memory_space<vmem>>, vector<16x512xbf16>
    %c48 = arith.constant 48 : index
    %c0_23 = arith.constant 0 : index
    %27 = vector.load %arg11[%c48, %c0_23] : memref<432x512xbf16, #tpu.memory_space<vmem>>, vector<16x512xbf16>
    tpu.vector_store %arg11[%c48, %c0_23], %26 {strides = array<i32>} : memref<432x512xbf16, #tpu.memory_space<vmem>>, vector<16x512xbf16>,
    %c0_24 = arith.constant 0 : index
    %c28 = arith.constant 28 : index
    %28 = vector.load %arg10[%c0_24, %c28] : memref<16x768xbf16, #tpu.memory_space<vmem>>, vector<16x512xbf16>
    %c64 = arith.constant 64 : index
    %c0_25 = arith.constant 0 : index
    %29 = vector.load %arg11[%c64, %c0_25] : memref<432x512xbf16, #tpu.memory_space<vmem>>, vector<16x512xbf16>
    tpu.vector_store %arg11[%c64, %c0_25], %28 {strides = array<i32>} : memref<432x512xbf16, #tpu.memory_space<vmem>>, vector<16x512xbf16>,
    %c0_26 = arith.constant 0 : index
    %c29 = arith.constant 29 : index
    %30 = vector.load %arg10[%c0_26, %c29] : memref<16x768xbf16, #tpu.memory_space<vmem>>, vector<16x512xbf16>
    %c80 = arith.constant 80 : index
    %c0_27 = arith.constant 0 : index
    %31 = vector.load %arg11[%c80, %c0_27] : memref<432x512xbf16, #tpu.memory_space<vmem>>, vector<16x512xbf16>
    tpu.vector_store %arg11[%c80, %c0_27], %30 {strides = array<i32>} : memref<432x512xbf16, #tpu.memory_space<vmem>>, vector<16x512xbf16>,
    %c0_28 = arith.constant 0 : index
    %c37 = arith.constant 37 : index
    %32 = vector.load %arg10[%c0_28, %c37] : memref<16x768xbf16, #tpu.memory_space<vmem>>, vector<16x512xbf16>
    %c96 = arith.constant 96 : index
    %c0_29 = arith.constant 0 : index
    %33 = vector.load %arg11[%c96, %c0_29] : memref<432x512xbf16, #tpu.memory_space<vmem>>, vector<16x512xbf16>
    tpu.vector_store %arg11[%c96, %c0_29], %32 {strides = array<i32>} : memref<432x512xbf16, #tpu.memory_space<vmem>>, vector<16x512xbf16>,
    %c0_30 = arith.constant 0 : index
    %c38 = arith.constant 38 : index
    %34 = vector.load %arg10[%c0_30, %c38] : memref<16x768xbf16, #tpu.memory_space<vmem>>, vector<16x512xbf16>
    %c112 = arith.constant 112 : index
    %c0_31 = arith.constant 0 : index
    %35 = vector.load %arg11[%c112, %c0_31] : memref<432x512xbf16, #tpu.memory_space<vmem>>, vector<16x512xbf16>
    tpu.vector_store %arg11[%c112, %c0_31], %34 {strides = array<i32>} : memref<432x512xbf16, #tpu.memory_space<vmem>>, vector<16x512xbf16>,
    %c0_32 = arith.constant 0 : index
    %c39 = arith.constant 39 : index
    %36 = vector.load %arg10[%c0_32, %c39] : memref<16x768xbf16, #tpu.memory_space<vmem>>, vector<16x512xbf16>
    %c128_33 = arith.constant 128 : index
    %c0_34 = arith.constant 0 : index
    %37 = vector.load %arg11[%c128_33, %c0_34] : memref<432x512xbf16, #tpu.memory_space<vmem>>, vector<16x512xbf16>
    tpu.vector_store %arg11[%c128_33, %c0_34], %36 {strides = array<i32>} : memref<432x512xbf16, #tpu.memory_space<vmem>>, vector<16x512xbf16>,
    %c0_35 = arith.constant 0 : index
    %c117 = arith.constant 117 : index
    %38 = vector.load %arg10[%c0_35, %c117] : memref<16x768xbf16, #tpu.memory_space<vmem>>, vector<16x512xbf16>
    %c144 = arith.constant 144 : index
    %c0_36 = arith.constant 0 : index
    %39 = vector.load %arg11[%c144, %c0_36] : memref<432x512xbf16, #tpu.memory_space<vmem>>, vector<16x512xbf16>
    tpu.vector_store %arg11[%c144, %c0_36], %38 {strides = array<i32>} : memref<432x512xbf16, #tpu.memory_space<vmem>>, vector<16x512xbf16>,
    %c0_37 = arith.constant 0 : index
    %c118 = arith.constant 118 : index
    %40 = vector.load %arg10[%c0_37, %c118] : memref<16x768xbf16, #tpu.memory_space<vmem>>, vector<16x512xbf16>
    %c160 = arith.constant 160 : index
    %c0_38 = arith.constant 0 : index
    %41 = vector.load %arg11[%c160, %c0_38] : memref<432x512xbf16, #tpu.memory_space<vmem>>, vector<16x512xbf16>
    tpu.vector_store %arg11[%c160, %c0_38], %40 {strides = array<i32>} : memref<432x512xbf16, #tpu.memory_space<vmem>>, vector<16x512xbf16>,
    %c0_39 = arith.constant 0 : index
    %c119 = arith.constant 119 : index
    %42 = vector.load %arg10[%c0_39, %c119] : memref<16x768xbf16, #tpu.memory_space<vmem>>, vector<16x512xbf16>
    %c176 = arith.constant 176 : index
    %c0_40 = arith.constant 0 : index
    %43 = vector.load %arg11[%c176, %c0_40] : memref<432x512xbf16, #tpu.memory_space<vmem>>, vector<16x512xbf16>
    tpu.vector_store %arg11[%c176, %c0_40], %42 {strides = array<i32>} : memref<432x512xbf16, #tpu.memory_space<vmem>>, vector<16x512xbf16>,
    %c0_41 = arith.constant 0 : index
    %c127 = arith.constant 127 : index
    %44 = vector.load %arg10[%c0_41, %c127] : memref<16x768xbf16, #tpu.memory_space<vmem>>, vector<16x512xbf16>
    %c192 = arith.constant 192 : index
    %c0_42 = arith.constant 0 : index
    %45 = vector.load %arg11[%c192, %c0_42] : memref<432x512xbf16, #tpu.memory_space<vmem>>, vector<16x512xbf16>
    tpu.vector_store %arg11[%c192, %c0_42], %44 {strides = array<i32>} : memref<432x512xbf16, #tpu.memory_space<vmem>>, vector<16x512xbf16>,
    %c0_43 = arith.constant 0 : index
    %c128_44 = arith.constant 128 : index
    %46 = vector.load %arg10[%c0_43, %c128_44] : memref<16x768xbf16, #tpu.memory_space<vmem>>, vector<16x512xbf16>
    %c208 = arith.constant 208 : index
    %c0_45 = arith.constant 0 : index
    %47 = vector.load %arg11[%c208, %c0_45] : memref<432x512xbf16, #tpu.memory_space<vmem>>, vector<16x512xbf16>
    tpu.vector_store %arg11[%c208, %c0_45], %46 {strides = array<i32>} : memref<432x512xbf16, #tpu.memory_space<vmem>>, vector<16x512xbf16>,
    %c0_46 = arith.constant 0 : index
    %c129 = arith.constant 129 : index
    %48 = vector.load %arg10[%c0_46, %c129] : memref<16x768xbf16, #tpu.memory_space<vmem>>, vector<16x512xbf16>
    %c224 = arith.constant 224 : index
    %c0_47 = arith.constant 0 : index
    %49 = vector.load %arg11[%c224, %c0_47] : memref<432x512xbf16, #tpu.memory_space<vmem>>, vector<16x512xbf16>
    tpu.vector_store %arg11[%c224, %c0_47], %48 {strides = array<i32>} : memref<432x512xbf16, #tpu.memory_space<vmem>>, vector<16x512xbf16>,
    %c0_48 = arith.constant 0 : index
    %c137 = arith.constant 137 : index
    %50 = vector.load %arg10[%c0_48, %c137] : memref<16x768xbf16, #tpu.memory_space<vmem>>, vector<16x512xbf16>
    %c240 = arith.constant 240 : index
    %c0_49 = arith.constant 0 : index
    %51 = vector.load %arg11[%c240, %c0_49] : memref<432x512xbf16, #tpu.memory_space<vmem>>, vector<16x512xbf16>
    tpu.vector_store %arg11[%c240, %c0_49], %50 {strides = array<i32>} : memref<432x512xbf16, #tpu.memory_space<vmem>>, vector<16x512xbf16>,
    %c0_50 = arith.constant 0 : index
    %c138 = arith.constant 138 : index
    %52 = vector.load %arg10[%c0_50, %c138] : memref<16x768xbf16, #tpu.memory_space<vmem>>, vector<16x512xbf16>
    %c256 = arith.constant 256 : index
    %c0_51 = arith.constant 0 : index
    %53 = vector.load %arg11[%c256, %c0_51] : memref<432x512xbf16, #tpu.memory_space<vmem>>, vector<16x512xbf16>
    tpu.vector_store %arg11[%c256, %c0_51], %52 {strides = array<i32>} : memref<432x512xbf16, #tpu.memory_space<vmem>>, vector<16x512xbf16>,
    %c0_52 = arith.constant 0 : index
    %c139 = arith.constant 139 : index
    %54 = vector.load %arg10[%c0_52, %c139] : memref<16x768xbf16, #tpu.memory_space<vmem>>, vector<16x512xbf16>
    %c272 = arith.constant 272 : index
    %c0_53 = arith.constant 0 : index
    %55 = vector.load %arg11[%c272, %c0_53] : memref<432x512xbf16, #tpu.memory_space<vmem>>, vector<16x512xbf16>
    tpu.vector_store %arg11[%c272, %c0_53], %54 {strides = array<i32>} : memref<432x512xbf16, #tpu.memory_space<vmem>>, vector<16x512xbf16>,
    %c0_54 = arith.constant 0 : index
    %c217 = arith.constant 217 : index
    %56 = vector.load %arg10[%c0_54, %c217] : memref<16x768xbf16, #tpu.memory_space<vmem>>, vector<16x512xbf16>
    %c288 = arith.constant 288 : index
    %c0_55 = arith.constant 0 : index
    %57 = vector.load %arg11[%c288, %c0_55] : memref<432x512xbf16, #tpu.memory_space<vmem>>, vector<16x512xbf16>
    tpu.vector_store %arg11[%c288, %c0_55], %56 {strides = array<i32>} : memref<432x512xbf16, #tpu.memory_space<vmem>>, vector<16x512xbf16>,
    %c0_56 = arith.constant 0 : index
    %c218 = arith.constant 218 : index
    %58 = vector.load %arg10[%c0_56, %c218] : memref<16x768xbf16, #tpu.memory_space<vmem>>, vector<16x512xbf16>
    %c304 = arith.constant 304 : index
    %c0_57 = arith.constant 0 : index
    %59 = vector.load %arg11[%c304, %c0_57] : memref<432x512xbf16, #tpu.memory_space<vmem>>, vector<16x512xbf16>
    tpu.vector_store %arg11[%c304, %c0_57], %58 {strides = array<i32>} : memref<432x512xbf16, #tpu.memory_space<vmem>>, vector<16x512xbf16>,
    %c0_58 = arith.constant 0 : index
    %c219 = arith.constant 219 : index
    %60 = vector.load %arg10[%c0_58, %c219] : memref<16x768xbf16, #tpu.memory_space<vmem>>, vector<16x512xbf16>
    %c320 = arith.constant 320 : index
    %c0_59 = arith.constant 0 : index
    %61 = vector.load %arg11[%c320, %c0_59] : memref<432x512xbf16, #tpu.memory_space<vmem>>, vector<16x512xbf16>
    tpu.vector_store %arg11[%c320, %c0_59], %60 {strides = array<i32>} : memref<432x512xbf16, #tpu.memory_space<vmem>>, vector<16x512xbf16>,
    %c0_60 = arith.constant 0 : index
    %c227 = arith.constant 227 : index
    %62 = vector.load %arg10[%c0_60, %c227] : memref<16x768xbf16, #tpu.memory_space<vmem>>, vector<16x512xbf16>
    %c336 = arith.constant 336 : index
    %c0_61 = arith.constant 0 : index
    %63 = vector.load %arg11[%c336, %c0_61] : memref<432x512xbf16, #tpu.memory_space<vmem>>, vector<16x512xbf16>
    tpu.vector_store %arg11[%c336, %c0_61], %62 {strides = array<i32>} : memref<432x512xbf16, #tpu.memory_space<vmem>>, vector<16x512xbf16>,
    %c0_62 = arith.constant 0 : index
    %c228 = arith.constant 228 : index
    %64 = vector.load %arg10[%c0_62, %c228] : memref<16x768xbf16, #tpu.memory_space<vmem>>, vector<16x512xbf16>
    %c352 = arith.constant 352 : index
    %c0_63 = arith.constant 0 : index
    %65 = vector.load %arg11[%c352, %c0_63] : memref<432x512xbf16, #tpu.memory_space<vmem>>, vector<16x512xbf16>
    tpu.vector_store %arg11[%c352, %c0_63], %64 {strides = array<i32>} : memref<432x512xbf16, #tpu.memory_space<vmem>>, vector<16x512xbf16>,
    %c0_64 = arith.constant 0 : index
    %c229 = arith.constant 229 : index
    %66 = vector.load %arg10[%c0_64, %c229] : memref<16x768xbf16, #tpu.memory_space<vmem>>, vector<16x512xbf16>
    %c368 = arith.constant 368 : index
    %c0_65 = arith.constant 0 : index
    %67 = vector.load %arg11[%c368, %c0_65] : memref<432x512xbf16, #tpu.memory_space<vmem>>, vector<16x512xbf16>
    tpu.vector_store %arg11[%c368, %c0_65], %66 {strides = array<i32>} : memref<432x512xbf16, #tpu.memory_space<vmem>>, vector<16x512xbf16>,
    %c0_66 = arith.constant 0 : index
    %c237 = arith.constant 237 : index
    %68 = vector.load %arg10[%c0_66, %c237] : memref<16x768xbf16, #tpu.memory_space<vmem>>, vector<16x512xbf16>
    %c384_67 = arith.constant 384 : index
    %c0_68 = arith.constant 0 : index
    %69 = vector.load %arg11[%c384_67, %c0_68] : memref<432x512xbf16, #tpu.memory_space<vmem>>, vector<16x512xbf16>
    tpu.vector_store %arg11[%c384_67, %c0_68], %68 {strides = array<i32>} : memref<432x512xbf16, #tpu.memory_space<vmem>>, vector<16x512xbf16>,
    %c0_69 = arith.constant 0 : index
    %c238 = arith.constant 238 : index
    %70 = vector.load %arg10[%c0_69, %c238] : memref<16x768xbf16, #tpu.memory_space<vmem>>, vector<16x512xbf16>
    %c400 = arith.constant 400 : index
    %c0_70 = arith.constant 0 : index
    %71 = vector.load %arg11[%c400, %c0_70] : memref<432x512xbf16, #tpu.memory_space<vmem>>, vector<16x512xbf16>
    tpu.vector_store %arg11[%c400, %c0_70], %70 {strides = array<i32>} : memref<432x512xbf16, #tpu.memory_space<vmem>>, vector<16x512xbf16>,
    %c0_71 = arith.constant 0 : index
    %c239 = arith.constant 239 : index
    %72 = vector.load %arg10[%c0_71, %c239] : memref<16x768xbf16, #tpu.memory_space<vmem>>, vector<16x512xbf16>
    %c416 = arith.constant 416 : index
    %c0_72 = arith.constant 0 : index
    %73 = vector.load %arg11[%c416, %c0_72] : memref<432x512xbf16, #tpu.memory_space<vmem>>, vector<16x512xbf16>
    tpu.vector_store %arg11[%c416, %c0_72], %72 {strides = array<i32>} : memref<432x512xbf16, #tpu.memory_space<vmem>>, vector<16x512xbf16>,
    %c0_73 = arith.constant 0 : index
    %c0_74 = arith.constant 0 : index
    %74 = vector.load %arg7[%c0_73, %c0_74] : memref<16x432xbf16, #tpu.memory_space<vmem>>, vector<16x432xbf16>
    %c0_75 = arith.constant 0 : index
    %c0_76 = arith.constant 0 : index
    %75 = vector.load %arg11[%c0_75, %c0_76] : memref<432x512xbf16, #tpu.memory_space<vmem>>, vector<432x512xbf16>
    %cst_77 = arith.constant dense<0.000000e+00> : vector<16x512xf32>
    %76 = tpu.matmul %74, %75, %cst_77 {dimension_numbers = #tpu.dot_dimension_numbers<[1], [0], [0], [1], [0, 0, 1, 1], [], []>} : vector<16x432xbf16>, vector<432x512xbf16>, vector<16x512xf32> -> vector<16x512xf32>
    %c0_78 = arith.constant 0 : index
    %c0_79 = arith.constant 0 : index
    %77 = vector.load %arg8[%c0_78, %c0_79] : memref<16x1xf32, #tpu.memory_space<vmem>>, vector<16x1xf32>
    %78 = vector.broadcast %77 : vector<16x1xf32> to vector<16x512xf32>
    %79 = arith.addf %76, %78 : vector<16x512xf32>
    %c0_80 = arith.constant 0 : index
    %c0_81 = arith.constant 0 : index
    %80 = vector.load %arg5[%c0_80, %c0_81] : memref<1x512xf32, #tpu.memory_space<vmem>>, vector<1x512xf32>
    %81 = vector.broadcast %80 : vector<1x512xf32> to vector<16x512xf32>
    %82 = arith.mulf %79, %81 : vector<16x512xf32>
    %c0_82 = arith.constant 0 : index
    %c0_83 = arith.constant 0 : index
    %83 = vector.load %arg9[%c0_82, %c0_83] : memref<16x512xf32, #tpu.memory_space<vmem>>, vector<16x512xf32>
    tpu.vector_store %arg9[%c0_82, %c0_83], %82 {strides = array<i32>} : memref<16x512xf32, #tpu.memory_space<vmem>>, vector<16x512xf32>,
    return
  }
  func.func @transform_0(%arg0: i32) -> (i32, i32) {
    %c0_i32 = arith.constant 0 : i32
    %c0_i32_0 = arith.constant 0 : i32
    return %c0_i32, %arg0 : i32, i32
  }
  func.func @transform_1(%arg0: i32) -> (i32, i32) {
    %c1_i32 = arith.constant 1 : i32
    %0 = arith.addi %arg0, %c1_i32 : i32
    %c0_i32 = arith.constant 0 : i32
    %c0_i32_0 = arith.constant 0 : i32
    return %c0_i32, %0 : i32, i32
  }
  func.func @transform_2(%arg0: i32) -> (i32, i32) {
    %c2_i32 = arith.constant 2 : i32
    %0 = arith.addi %arg0, %c2_i32 : i32
    %c0_i32 = arith.constant 0 : i32
    %c0_i32_0 = arith.constant 0 : i32
    return %c0_i32, %0 : i32, i32
  }
  func.func @transform_3(%arg0: i32) -> (i32, i32) {
    %c0_i32 = arith.constant 0 : i32
    %c0_i32_0 = arith.constant 0 : i32
    return %c0_i32, %arg0 : i32, i32
  }
  func.func @transform_4(%arg0: i32) -> (i32, i32) {
    %c1_i32 = arith.constant 1 : i32
    %0 = arith.addi %arg0, %c1_i32 : i32
    %c0_i32 = arith.constant 0 : i32
    %c0_i32_0 = arith.constant 0 : i32
    return %c0_i32, %0 : i32, i32
  }
  func.func @transform_5(%arg0: i32) -> (i32, i32) {
    %c2_i32 = arith.constant 2 : i32
    %0 = arith.addi %arg0, %c2_i32 : i32
    %c0_i32 = arith.constant 0 : i32
    %c0_i32_0 = arith.constant 0 : i32
    return %c0_i32, %0 : i32, i32
  }
  func.func @transform_6(%arg0: i32) -> (i32, i32) {
    %c0_i32 = arith.constant 0 : i32
    %c0_i32_0 = arith.constant 0 : i32
    %c0_i32_1 = arith.constant 0 : i32
    return %c0_i32, %c0_i32_0 : i32, i32
  }
  func.func @transform_7(%arg0: i32) -> (i32, i32) {
    %c0_i32 = arith.constant 0 : i32
    %c0_i32_0 = arith.constant 0 : i32
    %c0_i32_1 = arith.constant 0 : i32
    return %c0_i32, %c0_i32_0 : i32, i32
  }
  func.func @transform_8(%arg0: i32) -> (i32, i32) {
    %c1_i32 = arith.constant 1 : i32
    %0 = arith.addi %arg0, %c1_i32 : i32
    %c0_i32 = arith.constant 0 : i32
    %c0_i32_0 = arith.constant 0 : i32
    return %c0_i32, %0 : i32, i32
  }
}

</mosaic_0001>

<bundles_post_ra>
// kernel: tpu_custom_call.1
= control target key start
LH: loop header
LB: loop body
LE: loop exit
PB: predicated region body
PF: predicated region fallthrough
CT: control target
= control target key end

     0   :  { %s5036_s0 = inlined_call_operand.hbm [shape: bf16[16,2048], index: 0, kind: input, shape index: {}]   ;;  %s5037_s1 = inlined_call_operand.hbm [shape: bf16[16,2048], index: 1, kind: input, shape index: {}]   ;;  %s5038_s2 = inlined_call_operand.hbm [shape: bf16[16,2048], index: 2, kind: input, shape index: {}]   ;;  %s5039_s3 = inlined_call_operand.vmem [shape: f32[1,2048], index: 3, kind: input, shape index: {}]   ;;  %s5040_s4 = inlined_call_operand.hbm [shape: f32[1,2048], index: 4, kind: input, shape index: {}]   ;;  %s5041_s5 = inlined_call_operand.hbm [shape: f32[1,2048], index: 5, kind: input, shape index: {}]   ;;  %s5042_s6 = inlined_call_operand.hbm [shape: bf16[16,432], index: 6, kind: input, shape index: {}]   ;;  %s5043_s7 = inlined_call_operand.vmem [shape: f32[16,1], index: 7, kind: input, shape index: {}]   ;;  %s5044_s8 = inlined_call_operand.hbm [shape: f32[16,2048], index: 8, kind: output, shape index: {}]  }
   0x1   :  { %5140 = sst [smem:[#allocation36_spill]] %s5036_s0 }
   0x2   :  { %5141 = sst [smem:[#allocation37_spill]] %s5037_s1 }
   0x3   :  { %5142 = sst [smem:[#allocation38_spill]] %s5038_s2 }
   0x4   :  { %5143 = sst [smem:[#allocation39_spill]] %s5039_s3 }
   0x5   :  { %5144 = sst [smem:[#allocation40_spill]] %s5040_s4 }
   0x6   :  { %5145 = sst [smem:[#allocation41_spill]] %s5042_s6 }
   0x7   :  { %5146 = sst [smem:[#allocation42_spill]] %s5043_s7 }
   0x8   :  { %5147 = sst [smem:[#allocation43_spill]] %s5044_s8 }
   0x9   :  { %13 = vsyncpa [#allocation5], 0 }
   0xa   :  { %15 = vsyncpa [#allocation5 + $0x1], 0 }
   0xb   :  { %16 = vsyncpa [#allocation8], 0 }
   0xc   :  { %18 = vsyncpa [#allocation8 + $0x1], 0 }
   0xd   :  { %19 = vsyncpa [#allocation11], 0 }
   0xe   :  { %21 = vsyncpa [#allocation11 + $0x1], 0 }
   0xf   :  { %22 = vsyncpa [#allocation14], 0 }
  0x10   :  { %23 = vsyncpa [#allocation6], 0 }
  0x11   :  { %25 = vsyncpa [#allocation6 + $0x1], 0  ;;  %s3604_s27 = smov 0   ;;  %s3606_s28 = smov 0  }
  0x12   :  { %s3608_s29 = smov 0   ;;  %s3610_s30 = smov 0  }
  0x13   :  { %s3612_s9 = smov 0   ;;  %s3614_s10 = smov 0  }
  0x14   :  { %s3616_s11 = smov 0   ;;  %s3618_s12 = smov 0  }
  0x15   :  { %s3620_s13 = smov 0   ;;  %s3622_s14 = smov 0  }
  0x16 LB: > { %5148 = sst [smem:[#allocation23_spill]] %s3489_s29  ;;  %s2898_s15 = sadd.s32 4294967294, %s3517_s14   ;;  %s3517_s14 = sphi %s3622_s14, %s5291_s14   ;;  %s3513_s13 = sphi %s3620_s13, %s5284_s13   ;;  %s3509_s12 = sphi %s3618_s12, %s5290_s12   ;;  %s3505_s11 = sphi %s3616_s11, %s5282_s11   ;;  %s3501_s10 = sphi %s3614_s10, %s5281_s10   ;;  %s3497_s9 = sphi %s3612_s9, %s5289_s9   ;;  %s3493_s30 = sphi %s3610_s30, %s5288_s30   ;;  %s3489_s29 = sphi %s3608_s29, %s5287_s29   ;;  %s3485_s28 = sphi %s3606_s28, %s5286_s28   ;;  %s3481_s27 = sphi %s3604_s27, %s5285_s27  }
  0x17   : > { %5149 = sst [smem:[#allocation24_spill]] %s3493_s30  ;;  %s3656_s16 = sadd.s32 1, %s3517_s14  }
  0x18   : > { %5150 = sst [smem:[#allocation25_spill]] %s3501_s10  ;;  %p5050_p0 = scmp.eq.s32.totalorder %s3517_s14, 0 }
  0x19   : > { %5151 = sst [smem:[#allocation26_spill]] %s3505_s11  ;;  %s62_s17 = sadd.s32 1, %s3656_s16 }
  0x1a   : > { %5152 = sst [smem:[#allocation27_spill]] %s3509_s12  ;;  %s63_s18 = ssub.s32 %s3656_s16, %s62_s17 }
  0x1b   : > { %5153 = sst [smem:[#allocation28_spill]] %s3513_s13  ;;  %s66_s19 = sadd.s32 1, %s3501_s10 }
  0x1c   : > { %p64_p1 = scmp.eq.s32.totalorder %s63_s18, 0  ;;  %p5051_p2 = scmp.ne.s32.totalorder %s3501_s10, %s3497_s9 }
  0x1d   : > { %p5052_p3 = scmp.ne.s32.totalorder %s3497_s9, %s3493_s30  ;;  %p263_p4 = scmp.eq.s32.totalorder %s2898_s15, 1 }
  0x1e   : > { %s3667_s20 = scalar_select %p64_p1, %s3501_s10, %s66_s19  }
  0x1f   : > { %p3674_p5 = por %p5051_p2, %p5050_p0  ;;  %p3681_p6 = por %p263_p4, %p5052_p3 }
  0x20   : > { %5154 = sst [smem:[#allocation29_spill]] %s3667_s20  ;;  %p5049_p8 = scmp.lt.s32.totalorder %s3517_s14, 2 }
  0x21   : > { %s5156_s22 = scalar_select %p3681_p6, 1, 0 }
  0x22   : > { %s3688_s23 = sshll.u32 %s3517_s14, 8  ;;  %s322_s25 = sand.u32 1, %s3501_s10  }
  0x23   : > { %5157 = sst [smem:[#allocation30_spill]] %s5156_s22  ;;  %s2905_s26 = sshll.u32 %s322_s25, 5 }
  0x24   : > { %5158 = sst [smem:[#allocation31_spill]] %s3688_s23  ;;  %s324_s20 = scalar_lea.vmem [#allocation7], %s2905_s26 }
  0x25   : > { %s5159_s1 = sld [smem:[#allocation37_spill]]  ;;  %s332_s8 = sshll.u32 %s324_s20, 4  ;;  %s3698_s8 = int_to_ptr.vmem [resolvable:$true] %s332_s8 }
  0x26   : > { %p3704_p9 = pnand %p5049_p8, %p3674_p5  ;;  %s3708_s24 = sshll.u32 %s322_s25, 2 }
  0x27   : > { %s5161_s15 = sand.u32 1, %s3517_s14  }
  0x28   : > { %s3712_s17 = scalar_lea.sflag [#allocation8], %s5161_s15  ;;  %p3216_p11 = pneg %p3704_p9 }
  0x2b   : > { %s2758_s18 = scalar_lea.hbm %s5159_s1, %s3688_s23  ;;  %s3219_s26 = scalar_lea.hbm %s5159_s1, 2048 }
  0x2c   : > { %s3696_s19 = scalar_lea.hbm %s2758_s18, 256  ;;  %s3242_s7 = scalar_lea.hbm %s2758_s18, 768 }
  0x2d   : > { %p3215_p10 = scmp.ne.s32.totalorder %s3696_s19, %s3242_s7  ;;  %p3220_p1 = scmp.lt.s32.totalorder %s3696_s19, %s5159_s1 }
  0x2e   : > { %p3221_p4 = scmp.lt.s32.totalorder %s3219_s26, %s3242_s7 }
  0x2f   : > { %p3217_p12 = pnand %p3216_p11, %p3215_p10 }
  0x30   : > { %p3222_p5 = por %p3221_p4, %p3220_p1 }
  0x31   : > { %p3218_p13 = pneg %p3217_p12 }
  0x33   : > { %p3223_p7 = pnand %p3222_p5, %p3218_p13 }
  0x35   : > { %3226 = shalt.err (!%p3223_p7)
}
  0x36   : > { %s3227_s25 = scalar_lea.vmem %s3698_s8, 512  ;;  %s3519_s18 = smov [#allocation7]  }
  0x37   : > { %p3228_p8 = scmp.ne.s32.totalorder %s3698_s8, %s3227_s25  ;;  %s3232_s15 = sshll.u32 %s3519_s18, 4  ;;  %s3233_s15 = int_to_ptr.vmem [resolvable:$false] %s3232_s15 }
  0x38   : > { %s3234_s20 = scalar_lea.vmem %s3233_s15, 1024  ;;  %p3235_p0 = scmp.lt.s32.totalorder %s3698_s8, %s3233_s15 }
  0x39   : > { %p3230_p10 = pnand %p3228_p8, %p3216_p11  ;;  %p3236_p2 = scmp.lt.s32.totalorder %s3234_s20, %s3227_s25 }
  0x3b   : > { %p3231_p12 = pneg %p3230_p10  ;;  %p3237_p3 = por %p3236_p2, %p3235_p0 }
  0x3d   : > { %p3238_p1 = pnand %p3237_p3, %p3231_p12 }
  0x3f   : > { %3241 = shalt.err (!%p3238_p1)
}
  0x40   : > { %s5061_s2 = smov 1024   ;;  %s5064_s3 = smov 256  }
  0x41   : > { %s5066_s7 = smov 16   ;;  %s2910_s21 = sshll.u32 %s3517_s14, 6 }
  0x42   : > { %3067 = dma.hbm_to_vmem [thread:$0]  (!%p3704_p9), %s3696_s19, 512, %s3698_s8, %s3712_s17, %s5061_s2, %s5064_s3, %s5066_s7  }
  0x43   : > { %s376_s26 = scalar_lea.vmem [#allocation10], %s3708_s24  ;;  %s5162_s4 = sld [smem:[#allocation40_spill]] }
  0x44   : > { %s385_s25 = sshll.u32 %s376_s26, 4  ;;  %s3749_s23 = scalar_lea.hbm %s5041_s5, %s2910_s21  ;;  %s386_s25 = int_to_ptr.vmem [resolvable:$true] %s385_s25 }
  0x45   : > { %s5163_s11 = sand.u32 1, %s3517_s14  }
  0x46   : > { %s3753_s12 = scalar_lea.sflag [#allocation11], %s5163_s11 }
  0x49   : > { %s2771_s20 = scalar_lea.hbm %s5162_s4, %s2910_s21  ;;  %s3248_s19 = scalar_lea.hbm %s5162_s4, 256 }
  0x4a   : > { %s2772_s1 = scalar_lea.hbm %s2771_s20, 64  ;;  %s3271_s13 = scalar_lea.hbm %s2771_s20, 128 }
  0x4b   : > { %p3244_p0 = scmp.ne.s32.totalorder %s2772_s1, %s3271_s13  ;;  %p3249_p7 = scmp.lt.s32.totalorder %s2772_s1, %s5162_s4 }
  0x4c   : > { %p3250_p8 = scmp.lt.s32.totalorder %s3248_s19, %s3271_s13 }
  0x4d   : > { %p3246_p2 = pnand %p3244_p0, %p3216_p11 }
  0x4e   : > { %p3251_p13 = por %p3250_p8, %p3249_p7 }
  0x4f   : > { %p3247_p3 = pneg %p3246_p2 }
  0x51   : > { %p3252_p4 = pnand %p3251_p13, %p3247_p3 }
  0x53   : > { %3255 = shalt.err (!%p3252_p4)
}
  0x54   : > { %s3256_s0 = scalar_lea.vmem %s386_s25, 64  ;;  %s3523_s29 = smov [#allocation10]  }
  0x55   : > { %p3257_p5 = scmp.ne.s32.totalorder %s386_s25, %s3256_s0  ;;  %s3261_s11 = sshll.u32 %s3523_s29, 4  ;;  %s3262_s11 = int_to_ptr.vmem [resolvable:$false] %s3261_s11 }
  0x56   : > { %s3263_s21 = scalar_lea.vmem %s3262_s11, 128  ;;  %p3264_p1 = scmp.lt.s32.totalorder %s386_s25, %s3262_s11 }
  0x57   : > { %p3259_p10 = pnand %p3257_p5, %p3216_p11  ;;  %p3265_p0 = scmp.lt.s32.totalorder %s3263_s21, %s3256_s0 }
  0x59   : > { %p3260_p12 = pneg %p3259_p10  ;;  %p3266_p2 = por %p3265_p0, %p3264_p1 }
  0x5b   : > { %p3267_p6 = pnand %p3266_p2, %p3260_p12 }
  0x5d   : > { %3270 = shalt.err (!%p3267_p6)
}
  0x5e   : > { %3073 = dma.hbm_to_vmem [thread:$0]  (!%p3704_p9), %s2772_s1, 64, %s386_s25, %s3753_s12  }
  0x5f   : > { %s3771_s13 = sadd.s32 4294967295, %s3517_s14   ;;  %p107_p6 = scmp.ne.s32.totalorder %s3485_s28, %s3481_s27 }
  0x60   : > { %p5068_p11 = scmp.eq.s32.totalorder %s3771_s13, 0  ;;  %p257_p3 = scmp.eq.s32.totalorder %s3771_s13, 1 }
  0x61   : > { %p2899_p7 = scmp.ge.s32.totalorder %s3517_s14, 1  ;;  %p270_p8 = scmp.lt.s32.totalorder %s3517_s14, 3 }
  0x62   : > { %p5164_p13 = scmp.ne.s32.totalorder %s3497_s9, %s3493_s30  ;;  %p3790_p9 = por %p107_p6, %p5068_p11 }
  0x63   : > { %p5169_p5 = scmp.ne.s32.totalorder %s3501_s10, %s3497_s9  ;;  %p3801_p12 = pnand %p2899_p7, %p270_p8 }
  0x64   : > { %p3784_p4 = por %p5164_p13, %p5068_p11  ;;  %s3524_s15 = smov [#allocation13]  }
  0x65   : > { %s5167_s1 = scalar_select %p3790_p9, 1, 0 }
  0x66   : > { %s5165_s22 = scalar_select %p3784_p4, 1, 0 }
  0x67   : > { %5168 = sst [smem:[#allocation33_spill]] %s5167_s1  ;;  %p3797_p10 = por %p257_p3, %p5169_p5 }
  0x68   : > { %5166 = sst [smem:[#allocation32_spill]] %s5165_s22  ;;  %p3057_p1 = pneg %p3801_p12 }
  0x69   : > { %s5170_s25 = scalar_select %p3797_p10, 1, 0 }
  0x6a   : > { %s5172_s27 = scalar_select %p3801_p12, 1, 0 }
  0x6b   : > { %5171 = sst [smem:[#allocation34_spill]] %s5170_s25  ;;  %s282_s20 = sshll.u32 %s3524_s15, 4  ;;  %s283_s20 = int_to_ptr.vmem [resolvable:$true] %s282_s20 }
  0x6c   : > { %p3058_p0 = pnand %p3057_p1, %p5068_p11  ;;  %s3283_s8 = scalar_lea.vmem %s283_s20, 512 }
  0x6d   : > { %p3284_p6 = scmp.ne.s32.totalorder %s283_s20, %s3283_s8  ;;  %p3291_p5 = scmp.lt.s32.totalorder %s283_s20, %s283_s20 }
  0x6e   : > { %p3274_p2 = pneg %p3058_p0  ;;  %p3292_p9 = scmp.lt.s32.totalorder %s3283_s8, %s3283_s8 }
  0x70   : > { %p3286_p13 = pnand %p3284_p6, %p3274_p2  ;;  %p3293_p10 = por %p3292_p9, %p3291_p5 }
  0x72   : > { %p3287_p3 = pneg %p3286_p13 }
  0x74   : > { %p3294_p7 = pnand %p3293_p10, %p3287_p3 }
  0x76   : > { %3297 = shalt.err (!%p3294_p7)
}
  0x77   : > { %s5173_s6 = sld [smem:[#allocation41_spill]]  ;;  %s35_s11 = ssub.s32 %s3517_s14, %s3656_s16 }
  0x78   : > { %s5174_s26 = sld [smem:[#allocation28_spill]]  ;;  %p36_p8 = scmp.eq.s32.totalorder %s35_s11, 0 }
  0x79   : > { %s5175_s18 = sld [smem:[#allocation27_spill]]  ;;  %p5179_p1 = scmp.eq.s32.totalorder %s3517_s14, 0 }
  0x7a   : > { %s5176_s0 = sld [smem:[#allocation26_spill]] }
  0x7b   : > { %s5177_s29 = sld [smem:[#allocation31_spill]] }
  0x7c   : > { %s5181_s4 = sld [smem:[#allocation36_spill]] }
  0x7d   : > { %3060 = dma.hbm_to_vmem [thread:$0]  (!%p3058_p0), %s5173_s6, 512, %s283_s20, [#allocation14], %s5064_s3, %s5064_s3, %s5066_s7  }
  0x7e   : > { %s38_s21 = sadd.s32 1, %s5174_s26  ;;  %s299_s24 = sand.u32 1, %s5174_s26  }
  0x7f   : > { %p45_p9 = scmp.ne.s32.totalorder %s5174_s26, %s5175_s18  ;;  %s2902_s20 = sshll.u32 %s299_s24, 5 }
  0x80   : > { %p51_p10 = scmp.ne.s32.totalorder %s5175_s18, %s5176_s0  ;;  %p5182_p0 = scmp.lt.s32.totalorder %s3517_s14, 2 }
  0x81   : > { %s3823_s15 = scalar_select %p36_p8, %s5174_s26, %s38_s21  }
  0x82   : > { %p47_p2 = por %p5179_p1, %p45_p9  ;;  %p3829_p6 = por %p5068_p11, %p51_p10 }
  0x83   : > { %5178 = sst [smem:[#allocation35_spill]] %s3823_s15  ;;  %s3838_s10 = scalar_lea.hbm %s5181_s4, %s5177_s29 }
  0x84   : > { %s5180_s8 = scalar_select %p3829_p6, 1, 0 }
  0x85   : > { %p3842_p13 = pnand %p5182_p0, %p47_p2  ;;  %s303_s0 = scalar_lea.vmem [#allocation4], %s2902_s20 }
  0x86   : > { %s310_s11 = sshll.u32 %s303_s0, 4  ;;  %s3848_s26 = scalar_lea.sflag [#allocation5], %s299_s24  ;;  %s3846_s11 = int_to_ptr.vmem [resolvable:$true] %s310_s11 }
  0x87   : > { %s3298_s21 = scalar_lea.hbm %s3838_s10, 512  ;;  %p3300_p5 = pneg %p3842_p13 }
  0x88   : > { %p3299_p3 = scmp.ne.s32.totalorder %s3838_s10, %s3298_s21  ;;  %s3303_s3 = scalar_lea.hbm %s5181_s4, 2048 }
  0x89   : > { %p3304_p9 = scmp.lt.s32.totalorder %s3838_s10, %s5181_s4  ;;  %p3305_p10 = scmp.lt.s32.totalorder %s3303_s3, %s3298_s21 }
  0x8a   : > { %p3301_p7 = pnand %p3300_p5, %p3299_p3 }
  0x8b   : > { %p3306_p1 = por %p3305_p10, %p3304_p9 }
  0x8c   : > { %p3302_p8 = pneg %p3301_p7 }
  0x8e   : > { %p3307_p2 = pnand %p3306_p1, %p3302_p8 }
  0x90   : > { %3310 = shalt.err (!%p3307_p2)
}
  0x91   : > { %s3311_s24 = scalar_lea.vmem %s3846_s11, 512  ;;  %s3525_s20 = smov [#allocation4]  }
  0x92   : > { %p3312_p0 = scmp.ne.s32.totalorder %s3846_s11, %s3311_s24  ;;  %s3316_s0 = sshll.u32 %s3525_s20, 4  ;;  %s3317_s0 = int_to_ptr.vmem [resolvable:$false] %s3316_s0 }
  0x93   : > { %s3318_s2 = scalar_lea.vmem %s3317_s0, 1024  ;;  %p3319_p7 = scmp.lt.s32.totalorder %s3846_s11, %s3317_s0 }
  0x94   : > { %p3314_p11 = pnand %p3312_p0, %p3300_p5  ;;  %p3320_p4 = scmp.lt.s32.totalorder %s3318_s2, %s3311_s24 }
  0x96   : > { %p3315_p3 = pneg %p3314_p11  ;;  %p3321_p6 = por %p3320_p4, %p3319_p7 }
  0x98   : > { %p3322_p12 = pnand %p3321_p6, %p3315_p3 }
  0x9a   : > { %3325 = shalt.err (!%p3322_p12)
}
  0x9b   : > { %s5184_s6 = smov 16   ;;  %s5185_s3 = smov 256  }
  0x9c   : > { %s5186_s7 = smov 1024   ;;  %s5187_s21 = sld [smem:[#allocation23_spill]] }
  0x9d   : > { %3064 = dma.hbm_to_vmem [thread:$0]  (!%p3842_p13), %s3838_s10, 512, %s3846_s11, %s3848_s26, %s5186_s7, %s5185_s3, %s5184_s6  }
  0x9e   : > { %s89_s19 = sadd.s32 2, %s3517_s14  ;;  %s90_s24 = sadd.s32 2, %s3656_s16 }
  0x9f   : > { %s91_s20 = ssub.s32 %s89_s19, %s90_s24  ;;  %p5188_p12 = scmp.eq.s32.totalorder %s3517_s14, 0 }
  0xa0   : > { %p92_p4 = scmp.eq.s32.totalorder %s91_s20, 0  ;;  %s5189_s30 = sld [smem:[#allocation38_spill]] }
  0xa1   : > { %p5191_p13 = scmp.lt.s32.totalorder %s3517_s14, 2  ;;  %s3900_s24 = scalar_lea.hbm %s3749_s23, 128 }
  0xa2   : > { %s94_s18 = sadd.s32 1, %s5187_s21  ;;  %p101_p11 = scmp.ne.s32.totalorder %s5187_s21, %s3485_s28 }
  0xa3   : > { %s344_s0 = sand.u32 1, %s5187_s21   ;;  %s5293_s21 = smov (!%p92_p4, %s5187_s21), %s94_s18 }
  0xa4   : > { %p103_p6 = por %p101_p11, %p5188_p12  ;;  %s2907_s2 = sshll.u32 %s344_s0, 5 }
  0xa5   : > { %s346_s10 = scalar_lea.vmem [#allocation9], %s2907_s2  ;;  %s3897_s19 = sshll.u32 %s344_s0, 2 }
  0xa6   : > { %s5190_s25 = smov %s5189_s30  ;;  %s2764_s1 = scalar_lea.hbm %s5189_s30, %s5177_s29 }
  0xa7   : > { %s3887_s22 = scalar_lea.hbm %s2764_s1, 512  ;;  %s354_s11 = sshll.u32 %s346_s10, 4  ;;  %s3889_s11 = int_to_ptr.vmem [resolvable:$true] %s354_s11 }
  0xa8   : > { %p3893_p5 = pnand %p5191_p13, %p103_p6  ;;  %s3354_s4 = scalar_lea.hbm %s2764_s1, 1024 }
  0xa9   : > { %p3327_p8 = scmp.ne.s32.totalorder %s3887_s22, %s3354_s4  ;;  %s3331_s15 = scalar_lea.hbm %s5190_s25, 2048 }
  0xaa   : > { %p3328_p9 = pneg %p3893_p5  ;;  %p3332_p2 = scmp.lt.s32.totalorder %s3887_s22, %s5190_s25 }
  0xab   : > { %p3333_p0 = scmp.lt.s32.totalorder %s3331_s15, %s3354_s4 }
  0xac   : > { %p3329_p10 = pnand %p3328_p9, %p3327_p8 }
  0xad   : > { %p3334_p3 = por %p3333_p0, %p3332_p2 }
  0xae   : > { %p3330_p1 = pneg %p3329_p10 }
  0xb0   : > { %p3335_p7 = pnand %p3334_p3, %p3330_p1 }
  0xb2   : > { %3338 = shalt.err (!%p3335_p7)
}
  0xb3   : > { %s3339_s1 = scalar_lea.vmem %s3889_s11, 512  ;;  %s3526_s0 = smov [#allocation9]  }
  0xb4   : > { %p3340_p11 = scmp.ne.s32.totalorder %s3889_s11, %s3339_s1  ;;  %s3344_s2 = sshll.u32 %s3526_s0, 4  ;;  %s3345_s2 = int_to_ptr.vmem [resolvable:$false] %s3344_s2 }
  0xb5   : > { %s3346_s10 = scalar_lea.vmem %s3345_s2, 1024  ;;  %p3347_p6 = scmp.lt.s32.totalorder %s3889_s11, %s3345_s2 }
  0xb6   : > { %p3342_p4 = pnand %p3340_p11, %p3328_p9  ;;  %p3348_p13 = scmp.lt.s32.totalorder %s3346_s10, %s3339_s1 }
  0xb8   : > { %p3343_p12 = pneg %p3342_p4  ;;  %p3349_p8 = por %p3348_p13, %p3347_p6 }
  0xba   : > { %p3350_p10 = pnand %p3349_p8, %p3343_p12 }
  0xbc   : > { %3353 = shalt.err (!%p3350_p10)
}
  0xbd   : > { %3070 = dma.hbm_to_vmem [thread:$0]  (!%p3893_p5), %s3887_s22, 512, %s3889_s11, %s3712_s17, %s5186_s7, %s5185_s3, %s5184_s6  }
  0xbe   : > { %s396_s4 = scalar_lea.vmem [#allocation12], %s3897_s19  ;;  %s3383_s29 = scalar_lea.hbm %s3749_s23, 192 }
  0xbf   : > { %s405_s30 = sshll.u32 %s396_s4, 4  ;;  %p3356_p1 = scmp.ne.s32.totalorder %s3900_s24, %s3383_s29  ;;  %s406_s30 = int_to_ptr.vmem [resolvable:$true] %s405_s30 }
  0xc0   : > { %s3360_s20 = scalar_lea.hbm %s5041_s5, 256  ;;  %p3361_p3 = scmp.lt.s32.totalorder %s3900_s24, %s5041_s5 }
  0xc1   : > { %p3358_p2 = pnand %p3356_p1, %p3328_p9  ;;  %p3362_p7 = scmp.lt.s32.totalorder %s3360_s20, %s3383_s29 }
  0xc3   : > { %p3359_p0 = pneg %p3358_p2  ;;  %p3363_p11 = por %p3362_p7, %p3361_p3 }
  0xc5   : > { %p3364_p4 = pnand %p3363_p11, %p3359_p0 }
  0xc7   : > { %3367 = shalt.err (!%p3364_p4)
}
  0xc8   : > { %s3368_s17 = scalar_lea.vmem %s406_s30, 64  ;;  %s3527_s23 = smov [#allocation12]  }
  0xc9   : > { %p3369_p12 = scmp.ne.s32.totalorder %s406_s30, %s3368_s17  ;;  %s3373_s22 = sshll.u32 %s3527_s23, 4  ;;  %s3374_s22 = int_to_ptr.vmem [resolvable:$false] %s3373_s22 }
  0xca   : > { %s3375_s6 = scalar_lea.vmem %s3374_s22, 128  ;;  %p3376_p8 = scmp.lt.s32.totalorder %s406_s30, %s3374_s22 }
  0xcb   : > { %p3371_p6 = pnand %p3369_p12, %p3328_p9  ;;  %p3377_p10 = scmp.lt.s32.totalorder %s3375_s6, %s3368_s17 }
  0xcd   : > { %p3372_p13 = pneg %p3371_p6  ;;  %p3378_p1 = por %p3377_p10, %p3376_p8 }
  0xcf   : > { %p3379_p2 = pnand %p3378_p1, %p3372_p13 }
  0xd1   : > { %3382 = shalt.err (!%p3379_p2)
}
  0xd2   : > { %3076 = dma.hbm_to_vmem [thread:$0]  (!%p3893_p5), %s3900_s24, 64, %s406_s30, %s3753_s12  }
  0xd3   : > { %p5193_p0 = scmp.ne.s32.totalorder %s5172_s27, 0 }
  0xd4   : > { %s5194_s3 = sld [smem:[#allocation27_spill]] (!%p5193_p0)  ;;  %p5195_p9 = scmp.ne.s32.totalorder (!%p5193_p0), %s5180_s8, 0 }
  0xd5   : > { %414 = sbr.rel (%p5193_p0) target bundleno = 907 (0x38b), region = 52 }
  0xda   : > { %s416_s7 = sand.u32 1, %s5194_s3  }
  0xdb   : > { %s3952_s11 = sshll.u32 %s416_s7, 5  ;;  %s417_s19 = scalar_lea.sflag [#allocation5], %s416_s7 }
  0xdc   : > { %s420_s2 = scalar_lea.vmem [#allocation4], %s3952_s11 }
  0xdd   : > { %3452 = dma.done.wait (%p5195_p9), %s417_s19, 512  }
  0xde   : > { %3454 = vsyncadd (%p5195_p9), %s417_s19, 4294966784  ;;  %s5196_s26 = sld [smem:[#allocation32_spill]]  ;;  %s425_s12 = sand.u32 1, %s3771_s13  }
  0xdf   : > { %s3961_s24 = sand.u32 1, %s3497_s9   ;;  %s426_s10 = scalar_lea.sflag [#allocation8], %s425_s12 }
  0xe0   : > { %s2915_s27 = sshll.u32 %s3961_s24, 5 }
  0xe1   : > { %s3964_s4 = scalar_lea.vmem [#allocation7], %s2915_s27 }
  0xe4   : > { %p5197_p5 = scmp.ne.s32.totalorder %s5196_s26, 0 }
  0xe6   : > { %3456 = dma.done.wait (%p5197_p5), %s426_s10, 512  }
  0xe7   : > { %3458 = vsyncadd (%p5197_p5), %s426_s10, 4294966784  ;;  %s5198_s30 = sld [smem:[#allocation33_spill]]  ;;  %s436_s8 = sand.u32 1, %s3485_s28  }
  0xe8   : > { %s3971_s29 = sshll.u32 %s436_s8, 5 }
  0xe9   : > { %s438_s15 = scalar_lea.vmem [#allocation9], %s3971_s29 }
  0xed   : > { %p5199_p3 = scmp.ne.s32.totalorder %s5198_s30, 0 }
  0xef   : > { %3460 = dma.done.wait (%p5199_p3), %s426_s10, 512  }
  0xf0   : > { %3462 = vsyncadd (%p5199_p3), %s426_s10, 4294966784  ;;  %s2917_s18 = sshll.u32 %s3961_s24, 2  ;;  %s444_s20 = scalar_lea.sflag [#allocation11], %s425_s12 }
  0xf1   : > { %s3979_s1 = scalar_lea.vmem [#allocation10], %s2917_s18 }
  0xf2   : > { %3464 = dma.done.wait (%p5197_p5), %s444_s20, 64  }
  0xf3   : > { %3466 = vsyncadd (%p5197_p5), %s444_s20, 4294967232  ;;  %s3985_s0 = sshll.u32 %s436_s8, 2 }
  0xf4   : > { %s456_s17 = scalar_lea.vmem [#allocation12], %s3985_s0 }
  0xf5   : > { %3468 = dma.done.wait (%p5199_p3), %s444_s20, 64  }
  0xf6   : > { %3470 = vsyncadd (%p5199_p3), %s444_s20, 4294967232  ;;  %p5200_p7 = scmp.eq.s32.totalorder %s3771_s13, 0 }
  0xf8   : > { %3472 = dma.done.wait (%p5200_p7), [#allocation14], 512   ;;  %p5201_p11 = pmov %p5200_p7 }
  0xf9   : > { %v539_v0 = vlaneseq  ;;  %s2921_s23 = sshll.u32 %s3771_s13, 2  ;;  %v3528_v1 = vmov 0   ;;  %s5202_s3 = sld [smem:[#allocation39_spill]]  ;;  %v4005_v3 = vld [vmem:[%s3964_s4 + $0x10] sm:$0xff]  ;;  %v4008_v4 = vld [vmem:[%s3964_s4] sm:$0xff]  ;;  %v4011_v5 = vld [vmem:[%s3964_s4 + $0x18] sm:$0xff] }
  0xfa   : > { %3474 = vsyncadd (%p5201_p11), [#allocation14], 4294966784  ;;  %3200 = vset.pattern.permute.xlu1 %v3528_v1  ;;  %3199 = vset.pattern.permute.xlu0 %v3528_v1  ;;  %p523_p4 = scmp.lt.s32.totalorder %s2921_s23, 15  ;;  %555 = vst [vmem:[#allocation2 + $0x1c] sm:$0xff] %v4005_v3  ;;  %s3529_s19 = smov 27   ;;  %v4021_v6 = vld [vmem:[%s3964_s4 + $0x8] sm:$0xff] }
  0xfb   : > { %v3999_v2 = vshrl.u32 %v539_v0, 7  ;;  %1633 = vrot.lane.b32.xlu1 %v4005_v3, %s3529_s19  ;;  %553 = vst [vmem:[#allocation2 + $0x4] sm:$0xff] %v4008_v4  ;;  %1627 = vrot.lane.b32.xlu0 %v4008_v4, %s3529_s19  ;;  %556 = vst [vmem:[#allocation2 + $0x24] sm:$0xff] %v4011_v5  ;;  %v534_v11 = vld [vmem:[%s420_s2 + $0xc] sm:$0xf]  ;;  %s3530_s26 = smov 28  }
  0xfc   : > { %s5295_s23 = smov (!%p523_p4, %s2921_s23), 15  ;;  %554 = vst [vmem:[#allocation2 + $0xc] sm:$0xff] %v4021_v6  ;;  %v535_v12 = vld [vmem:[%s420_s2 + $0x1c] sm:$0xf]  ;;  %s3531_s12 = smov 90   ;;  %vm602_vm6 = vcmask 1043456  }
  0xfd   : > { %v4024_v7 = vsub.s32 0, %v3999_v2  ;;  %s3532_s11 = smov 91   ;;  %s3533_s2 = smov 29   ;;  %v559_v19 = vld [vmem:[%s456_s17] sm:$0x1]  ;;  %vm1646_vm7 = vcmask 220160  }
  0xfe   : > { %s3534_s27 = smov 99   ;;  %s3535_s10 = smov 37   ;;  %vm560_vm3 = vcmp.gt.f32.partialorder %v559_v19, 0.0  ;;  %v558_v22 = vld [vmem:[%s438_s15 + $0x10] sm:$0xf]  ;;  %vm933_vm8 = vcmask 736256  }
  0xff   : > { %s525_s7 = scalar_lea.vmem %s5202_s3, %s5295_s23  ;;  %1635 = vrot.lane.b32.xlu1 %v4011_v5, %s3529_s19  ;;  %1629 = vrot.lane.b32.xlu0 %v4021_v6, %s3529_s19  ;;  %s3536_s4 = smov 100   ;;  %v561_v20 = vsel %vm560_vm3, 1, %v3528_v1  ;;  %v557_v23 = vld [vmem:[%s438_s15] sm:$0xf]  ;;  %vm1599_vm9 = vcmask 228352   ;;  %vm886_vm10 = vcmask 744448  }
 0x100   : > { %v536_v8 = vld [vmem:[%s525_s7 + $0x3] sm:$0x1]  ;;  %s3537_s30 = smov 38   ;;  %s3538_s8 = smov 101   ;;  %v565_v21 = vrot.slane %v561_v20, %v4024_v7  ;;  %vm1552_vm11 = vcmask 236544   ;;  %vm839_vm12 = vcmask 809984  }
 0x101   : > { %vm537_vm0 = vcmp.gt.f32.partialorder %v536_v8, 0.0  ;;  %s3539_s18 = smov 39   ;;  %s3540_s20 = smov 109   ;;  %vm2486_vm13 = vcmask 392192   ;;  %vm1505_vm14 = vcmask 302080   ;;  %vm792_vm15 = vcmask 818176  }
 0x102   : > { %v538_v9 = vsel %vm537_vm0, 1, %v3528_v1  ;;  %v4043_v16 = vld [vmem:[#allocation2 + $0x20] sm:$0xff]  ;;  %vm566_vm4 = vcmp.eq.s32.totalorder %v565_v21, 1  ;;  %s3541_s23 = smov 117   ;;  %s3542_s0 = smov 110   ;;  %vm5114_vm0 = vcmask 310272  }
 0x103   : > { %v542_v10 = vrot.slane %v538_v9, %v4024_v7  ;;  %1580 = vrot.lane.b32.xlu0 %v4008_v4, %s3530_s26  ;;  %v4039_v13 = vld [vmem:[#allocation2 + $0x8] sm:$0xff]  ;;  %vm567_vm5 = vmpackc.low %vm566_vm4, %vm566_vm4  ;;  %s3543_s29 = smov 118   ;;  %s3544_s15 = smov 111   ;;  %vm698_vm3 = vcmask 891904   ;;  %vm5093_vm4 = vcmask 957440  }
 0x104   : > { %916 = vrot.lane.b32.xlu1 %v4039_v13, %s3531_s12  ;;  %v569_v24 = vsel %vm567_vm5, %v558_v22, 0  ;;  %v568_v25 = vsel %vm567_vm5, %v557_v23, 0  ;;  %s3545_s17 = smov 17   ;;  %s3546_s22 = smov 119   ;;  %vm651_vm5 = vcmask 900096  }
 0x105   : > { %vm543_vm1 = vcmp.eq.s32.totalorder %v542_v10, 1  ;;  %571 = vst [vmem:[#allocation2 + $0x2c] sm:$0xf] %v569_v24  ;;  %570 = vst [vmem:[#allocation2 + $0x14] sm:$0xf] %v568_v25  ;;  %s3547_s6 = smov 18  }
 0x106   : > { %vm544_vm2 = vmpackc.low %vm543_vm1, %vm543_vm1  ;;  %s3548_s3 = smov 127   ;;  %s5080_s7 = smov 19   ;;  %vm745_vm1 = vcmask 826368  }
 0x107   : > { %v545_v14 = vsel %vm544_vm2, %v534_v11, 0  ;;  %v546_v15 = vsel %vm544_vm2, %v535_v12, 0  ;;  %1586 = vrot.lane.b32.xlu0 %v4005_v3, %s3530_s26  ;;  %vm5104_vm2 = vcmask 318464  }
 0x108   : > { %547 = vst [vmem:[#allocation2] sm:$0xf] %v545_v14  ;;  %548 = vst [vmem:[#allocation2 + $0x18] sm:$0xf] %v546_v15  ;;  %922 = vrot.lane.b32.xlu1 %v4043_v16, %s3531_s12 }
 0x10c   : > { %1582 = vrot.lane.b32.xlu1 %v4021_v6, %s3530_s26 }
 0x10f   : > { %v4049_v17 = vld [vmem:[#allocation2] sm:$0xff]  ;;  %v4055_v18 = vld [vmem:[#allocation2 + $0x18] sm:$0xff] }
 0x110   : > { %914 = vrot.lane.b32.xlu0 %v4049_v17, %s3531_s12  ;;  %1588 = vrot.lane.b32.xlu1 %v4011_v5, %s3530_s26 }
 0x114   : > { %920 = vrot.lane.b32.xlu0 %v4055_v18, %s3531_s12  ;;  %869 = vrot.lane.b32.xlu1 %v4039_v13, %s3532_s11 }
 0x118   : > { %867 = vrot.lane.b32.xlu0 %v4049_v17, %s3532_s11  ;;  %875 = vrot.lane.b32.xlu1 %v4043_v16, %s3532_s11 }
 0x11c   : > { %873 = vrot.lane.b32.xlu0 %v4055_v18, %s3532_s11  ;;  %1535 = vrot.lane.b32.xlu1 %v4021_v6, %s3533_s2 }
 0x120   : > { %1533 = vrot.lane.b32.xlu0 %v4008_v4, %s3533_s2  ;;  %1541 = vrot.lane.b32.xlu1 %v4011_v5, %s3533_s2 }
 0x124   : > { %1539 = vrot.lane.b32.xlu0 %v4005_v3, %s3533_s2  ;;  %822 = vrot.lane.b32.xlu1 %v4039_v13, %s3534_s27 }
 0x128   : > { %820 = vrot.lane.b32.xlu0 %v4049_v17, %s3534_s27  ;;  %828 = vrot.lane.b32.xlu1 %v4043_v16, %s3534_s27 }
 0x12c   : > { %826 = vrot.lane.b32.xlu0 %v4055_v18, %s3534_s27  ;;  %1488 = vrot.lane.b32.xlu1 %v4021_v6, %s3535_s10 }
 0x130   : > { %1486 = vrot.lane.b32.xlu0 %v4008_v4, %s3535_s10  ;;  %1494 = vrot.lane.b32.xlu1 %v4011_v5, %s3535_s10 }
 0x134   : > { %1492 = vrot.lane.b32.xlu0 %v4005_v3, %s3535_s10  ;;  %775 = vrot.lane.b32.xlu1 %v4039_v13, %s3536_s4 }
 0x138   : > { %773 = vrot.lane.b32.xlu0 %v4049_v17, %s3536_s4  ;;  %781 = vrot.lane.b32.xlu1 %v4043_v16, %s3536_s4 }
 0x13c   : > { %779 = vrot.lane.b32.xlu0 %v4055_v18, %s3536_s4  ;;  %1441 = vrot.lane.b32.xlu1 %v4021_v6, %s3537_s30 }
 0x140   : > { %1439 = vrot.lane.b32.xlu0 %v4008_v4, %s3537_s30  ;;  %1447 = vrot.lane.b32.xlu1 %v4011_v5, %s3537_s30 }
 0x144   : > { %1445 = vrot.lane.b32.xlu0 %v4005_v3, %s3537_s30  ;;  %728 = vrot.lane.b32.xlu1 %v4039_v13, %s3538_s8 }
 0x148   : > { %726 = vrot.lane.b32.xlu0 %v4049_v17, %s3538_s8  ;;  %734 = vrot.lane.b32.xlu1 %v4043_v16, %s3538_s8 }
 0x14c   : > { %732 = vrot.lane.b32.xlu0 %v4055_v18, %s3538_s8  ;;  %1394 = vrot.lane.b32.xlu1 %v4021_v6, %s3539_s18 }
 0x150   : > { %1392 = vrot.lane.b32.xlu0 %v4008_v4, %s3539_s18  ;;  %1400 = vrot.lane.b32.xlu1 %v4011_v5, %s3539_s18 }
 0x154   : > { %1398 = vrot.lane.b32.xlu0 %v4005_v3, %s3539_s18  ;;  %681 = vrot.lane.b32.xlu1 %v4039_v13, %s3540_s20 }
 0x158   : > { %679 = vrot.lane.b32.xlu0 %v4049_v17, %s3540_s20  ;;  %687 = vrot.lane.b32.xlu1 %v4043_v16, %s3540_s20 }
 0x15c   : > { %685 = vrot.lane.b32.xlu0 %v4055_v18, %s3540_s20  ;;  %1347 = vrot.lane.b32.xlu1 %v4021_v6, %s3541_s23 }
 0x160   : > { %1345 = vrot.lane.b32.xlu0 %v4008_v4, %s3541_s23  ;;  %1353 = vrot.lane.b32.xlu1 %v4011_v5, %s3541_s23 }
 0x164   : > { %1351 = vrot.lane.b32.xlu0 %v4005_v3, %s3541_s23  ;;  %634 = vrot.lane.b32.xlu1 %v4039_v13, %s3542_s0 }
 0x168   : > { %632 = vrot.lane.b32.xlu0 %v4049_v17, %s3542_s0  ;;  %640 = vrot.lane.b32.xlu1 %v4043_v16, %s3542_s0 }
 0x16c   : > { %638 = vrot.lane.b32.xlu0 %v4055_v18, %s3542_s0  ;;  %1300 = vrot.lane.b32.xlu1 %v4021_v6, %s3543_s29 }
 0x16d   : > { %v1634_v26 = vpop.permute.xlu1 %1633  ;;  %v1628_v27 = vpop.permute.xlu0 %1627 }
 0x16e   : > { %v1642_v30 = vrot.slane %v1634_v26, 4  ;;  %v1639_v31 = vrot.slane %v1628_v27, 4 }
 0x170   : > { %1298 = vrot.lane.b32.xlu0 %v4008_v4, %s3543_s29  ;;  %1306 = vrot.lane.b32.xlu1 %v4011_v5, %s3543_s29 }
 0x171   : > { %v4165_v28 = vpop.permute.xlu1 %1635  ;;  %v4167_v29 = vpop.permute.xlu0 %1629 }
 0x172   : > { %v5102_v32 = vrot.slane %v4165_v28, 4  ;;  %v5101_v33 = vrot.slane %v4167_v29, 4 }
 0x174   : > { %1304 = vrot.lane.b32.xlu0 %v4005_v3, %s3543_s29  ;;  %586 = vrot.lane.b32.xlu1 %v4039_v13, %s3544_s15  ;;  %v1645_v34 = vsel %vm602_vm6, %v1639_v31, %v5101_v33  ;;  %v1650_v35 = vsel %vm602_vm6, %v1642_v30, %v5102_v32 }
 0x175   : > { %v1581_v36 = vpop.permute.xlu0 %1580  ;;  %v1647_v37 = vsel %vm1646_vm7, %v1628_v27, %v1645_v34  ;;  %v1651_v38 = vsel %vm1646_vm7, %v1634_v26, %v1650_v35 }
 0x176   : > { %v4183_v39 = vpop.permute.xlu1 %916  ;;  %v3019_v40 = vcombine.high %v1647_v37, %v1651_v38  ;;  %v3018_v41 = vcombine.low %v1647_v37, %v1651_v38  ;;  %v1592_v48 = vrot.slane %v1581_v36, 4 }
 0x177   : > { %v5128_v49 = vrot.slane %v4183_v39, 4 }
 0x178   : > { %584 = vrot.lane.b32.xlu0 %v4049_v17, %s3544_s15  ;;  %592 = vrot.lane.b32.xlu1 %v4043_v16, %s3544_s15 }
 0x179   : > { %2533 = vmatprep.subr.bf16.mxu1 %v3019_v40  ;;  %v1587_v42 = vpop.permute.xlu0 %1586 }
 0x17a   : > { %2534 = vmatpush1.bf16.msra.mxu1 %v3018_v41  ;;  %v4189_v43 = vpop.permute.xlu1 %922  ;;  %v1595_v50 = vrot.slane %v1587_v42, 4 }
 0x17b   : > { %v5129_v51 = vrot.slane %v4189_v43, 4 }
 0x17c   : > { %590 = vrot.lane.b32.xlu0 %v4055_v18, %s3544_s15  ;;  %1770 = vrot.lane.b32.xlu1 %v4021_v6, %s3545_s17 }
 0x17e   : > { %v4195_v44 = vpop.permute.xlu1 %1582 }
 0x17f   : > { %v5092_v46 = vrot.slane %v4195_v44, 4 }
 0x180   : > { %1768 = vrot.lane.b32.xlu0 %v4008_v4, %s3545_s17  ;;  %1776 = vrot.lane.b32.xlu1 %v4011_v5, %s3545_s17 }
 0x181   : > { %v1598_v57 = vsel %vm602_vm6, %v1592_v48, %v5092_v46  ;;  %v1617_v46 = vld [vmem:[#allocation2 + $0x14] sm:$0xf] }
 0x182   : > { %v915_v45 = vpop.permute.xlu0 %914  ;;  %v4204_v52 = vpop.permute.xlu1 %1588  ;;  %v1600_v0 = vsel %vm1599_vm9, %v1581_v36, %v1598_v57 }
 0x183   : > { %v926_v47 = vrot.slane %v915_v45, 4  ;;  %v5094_v54 = vrot.slane %v4204_v52, 4 }
 0x184   : > { %1774 = vrot.lane.b32.xlu0 %v4005_v3, %s3545_s17  ;;  %1253 = vrot.lane.b32.xlu1 %v4021_v6, %s3546_s22 }
 0x185   : > { %v932_v56 = vsel %vm602_vm6, %v926_v47, %v5128_v49  ;;  %v1603_v59 = vsel %vm602_vm6, %v1595_v50, %v5094_v54 }
 0x186   : > { %v921_v53 = vpop.permute.xlu0 %920  ;;  %v4223_v60 = vpop.permute.xlu1 %869  ;;  %v934_v62 = vsel %vm933_vm8, %v915_v45, %v932_v56  ;;  %v1604_v1 = vsel %vm1599_vm9, %v1587_v42, %v1603_v59 }
 0x187   : > { %v929_v55 = vrot.slane %v921_v53, 4  ;;  %v5123_v8 = vrot.slane %v4223_v60, 4  ;;  %v3015_v11 = vcombine.high %v1600_v0, %v1604_v1  ;;  %v3014_v12 = vcombine.low %v1600_v0, %v1604_v1  ;;  %v3203_v0 = vld [vmem:[#allocation13 + $0xc] ss:$16 sps:$4 sm:$0xff]  }
 0x188   : > { %1251 = vrot.lane.b32.xlu0 %v4008_v4, %s3546_s22  ;;  %1259 = vrot.lane.b32.xlu1 %v4011_v5, %s3546_s22 }
 0x189   : > { %v937_v58 = vsel %vm602_vm6, %v929_v55, %v5129_v51  ;;  %2535 = vmatprep.subr.bf16.mxu1 %v3015_v11  ;;  %3034 = vmatprep.mubr.msk.bf16.mxu1 %vm2486_vm13, %v3203_v0 }
 0x18a   : > { %v868_v61 = vpop.permute.xlu0 %867  ;;  %v938_v63 = vsel %vm933_vm8, %v921_v53, %v937_v58  ;;  %2536 = vmatpush1.bf16.msra.mxu1 %v3014_v12  ;;  %v4234_v15 = vpop.permute.xlu1 %875 }
 0x18b   : > { %v879_v9 = vrot.slane %v868_v61, 4  ;;  %v2955_v10 = vcombine.high %v934_v62, %v938_v63  ;;  %v2954_v14 = vcombine.low %v934_v62, %v938_v63  ;;  %v5126_v21 = vrot.slane %v4234_v15, 4 }
 0x18c   : > { %1257 = vrot.lane.b32.xlu0 %v4005_v3, %s3546_s22  ;;  %1723 = vrot.lane.b32.xlu1 %v4021_v6, %s3547_s6 }
 0x18d   : > { %2490 = vmatprep.subr.bf16.mxu0 %v2955_v10  ;;  %v885_v20 = vsel %vm602_vm6, %v879_v9, %v5123_v8  ;;  %v3204_v8 = vld [vmem:[#allocation2 + $0x8] ss:$24 sps:$4 sm:$0xff]  }
 0x18e   : > { %2491 = vmatpush1.bf16.msra.mxu0 %v2954_v14  ;;  %v874_v19 = vpop.permute.xlu0 %873  ;;  %v887_v24 = vsel %vm886_vm10, %v868_v61, %v885_v20  ;;  %v4249_v26 = vpop.permute.xlu1 %1535  ;;  %v907_v20 = vld [vmem:[#allocation2 + $0x28] sm:$0xf] }
 0x18f   : > { %v882_v22 = vrot.slane %v874_v19, 4  ;;  %v5089_v30 = vrot.slane %v4249_v26, 4 }
 0x190   : > { %1721 = vrot.lane.b32.xlu0 %v4008_v4, %s3547_s6  ;;  %1729 = vrot.lane.b32.xlu1 %v4011_v5, %s3547_s6 }
 0x191   : > { %v890_v23 = vsel %vm602_vm6, %v882_v22, %v5126_v21  ;;  %v904_v22 = vld [vmem:[#allocation2 + $0x10] sm:$0xf] }
 0x192   : > { %v891_v25 = vsel %vm886_vm10, %v874_v19, %v890_v23  ;;  %v1534_v27 = vpop.permute.xlu0 %1533  ;;  %v4256_v36 = vpop.permute.xlu1 %1541 }
 0x193   : > { %v1545_v31 = vrot.slane %v1534_v27, 4  ;;  %v2951_v34 = vcombine.high %v887_v24, %v891_v25  ;;  %v2950_v35 = vcombine.low %v887_v24, %v891_v25  ;;  %v5090_v40 = vrot.slane %v4256_v36, 4 }
 0x194   : > { %1727 = vrot.lane.b32.xlu0 %v4005_v3, %s3547_s6  ;;  %1206 = vrot.lane.b32.xlu1 %v4021_v6, %s3548_s3 }
 0x195   : > { %2492 = vmatprep.subr.bf16.mxu0 %v2951_v34  ;;  %v1551_v38 = vsel %vm602_vm6, %v1545_v31, %v5089_v30 }
 0x196   : > { %2493 = vmatpush1.bf16.msra.mxu0 %v2950_v35  ;;  %v1540_v37 = vpop.permute.xlu0 %1539  ;;  %v1553_v45 = vsel %vm1552_vm11, %v1534_v27, %v1551_v38  ;;  %v4271_v48 = vpop.permute.xlu1 %822 }
 0x197   : > { %v1548_v41 = vrot.slane %v1540_v37, 4  ;;  %v5121_v53 = vrot.slane %v4271_v48, 4 }
 0x198   : > { %1204 = vrot.lane.b32.xlu0 %v4008_v4, %s3548_s3  ;;  %1212 = vrot.lane.b32.xlu1 %v4011_v5, %s3548_s3 }
 0x199   : > { %v1556_v42 = vsel %vm602_vm6, %v1548_v41, %v5090_v40 }
 0x19a   : > { %v1557_v47 = vsel %vm1552_vm11, %v1540_v37, %v1556_v42  ;;  %v821_v50 = vpop.permute.xlu0 %820  ;;  %v4278_v58 = vpop.permute.xlu1 %828 }
 0x19b   : > { %v832_v55 = vrot.slane %v821_v50, 4  ;;  %v3011_v56 = vcombine.high %v1553_v45, %v1557_v47  ;;  %v3010_v57 = vcombine.low %v1553_v45, %v1557_v47  ;;  %v5122_v62 = vrot.slane %v4278_v58, 4 }
 0x19c   : > { %1210 = vrot.lane.b32.xlu0 %v4005_v3, %s3548_s3  ;;  %1676 = vrot.lane.b32.xlu1 %v4021_v6, %s5080_s7 }
 0x19d   : > { %2537 = vmatprep.subr.bf16.mxu1 %v3011_v56  ;;  %v838_v61 = vsel %vm602_vm6, %v832_v55, %v5121_v53 }
 0x19e   : > { %2538 = vmatpush1.bf16.msra.mxu1 %v3010_v57  ;;  %v827_v59 = vpop.permute.xlu0 %826  ;;  %v840_v9 = vsel %vm839_vm12, %v821_v50, %v838_v61  ;;  %v4293_v11 = vpop.permute.xlu1 %1488  ;;  %v860_v61 = vld [vmem:[#allocation2 + $0x28] sm:$0xf] }
 0x19f   : > { %v835_v63 = vrot.slane %v827_v59, 4  ;;  %v5086_v6 = vrot.slane %v4293_v11, 4 }
 0x1a0   : > { %1674 = vrot.lane.b32.xlu0 %v4008_v4, %s5080_s7  ;;  %1682 = vrot.lane.b32.xlu1 %v4011_v5, %s5080_s7 }
 0x1a1   : > { %v843_v1 = vsel %vm602_vm6, %v835_v63, %v5122_v62  ;;  %v857_v63 = vld [vmem:[#allocation2 + $0x10] sm:$0xf] }
 0x1a2   : > { %v844_v10 = vsel %vm839_vm12, %v827_v59, %v843_v1  ;;  %v1487_v12 = vpop.permute.xlu0 %1486  ;;  %v4301_v23 = vpop.permute.xlu1 %1494 }
 0x1a3   : > { %v1498_v14 = vrot.slane %v1487_v12, 4  ;;  %v2947_v19 = vcombine.high %v840_v9, %v844_v10  ;;  %v2946_v4 = vcombine.low %v840_v9, %v844_v10  ;;  %v5087_v27 = vrot.slane %v4301_v23, 4 }
 0x1a4   : > { %1680 = vrot.lane.b32.xlu0 %v4005_v3, %s5080_s7  ;;  %924 = vrot.lane.b32.xlu1 %v907_v20, %s3531_s12  ;;  %s3550_s7 = smov 1  }
 0x1a5   : > { %2494 = vmatprep.subr.bf16.mxu0 %v2947_v19  ;;  %v1504_v25 = vsel %vm602_vm6, %v1498_v14, %v5086_v6 }
 0x1a6   : > { %2495 = vmatpush1.bf16.msra.mxu0 %v2946_v4  ;;  %v1493_v24 = vpop.permute.xlu0 %1492  ;;  %v1506_v5 = vsel %vm1505_vm14, %v1487_v12, %v1504_v25  ;;  %v4314_v35 = vpop.permute.xlu1 %775 }
 0x1a7   : > { %v1501_v31 = vrot.slane %v1493_v24, 4  ;;  %v5116_v38 = vrot.slane %v4314_v35, 4 }
 0x1a8   : > { %918 = vrot.lane.b32.xlu0 %v904_v22, %s3531_s12  ;;  %1151 = vrot.lane.b32.xlu1 %v4039_v13, %s3550_s7  ;;  %s3551_s12 = smov 9  }
 0x1a9   : > { %v1509_v3 = vsel %vm602_vm6, %v1501_v31, %v5087_v27 }
 0x1aa   : > { %v1510_v34 = vsel %vm1505_vm14, %v1493_v24, %v1509_v3  ;;  %v774_v37 = vpop.permute.xlu0 %773  ;;  %v4321_v47 = vpop.permute.xlu1 %781 }
 0x1ab   : > { %v785_v41 = vrot.slane %v774_v37, 4  ;;  %v3007_v42 = vcombine.high %v1506_v5, %v1510_v34  ;;  %v3006_v45 = vcombine.low %v1506_v5, %v1510_v34  ;;  %v5117_v56 = vrot.slane %v4321_v47, 4 }
 0x1ac   : > { %1149 = vrot.lane.b32.xlu0 %v4049_v17, %s3550_s7  ;;  %1157 = vrot.lane.b32.xlu1 %v4043_v16, %s3550_s7 }
 0x1ad   : > { %2539 = vmatprep.subr.bf16.mxu1 %v3007_v42  ;;  %v791_v55 = vsel %vm602_vm6, %v785_v41, %v5116_v38 }
 0x1ae   : > { %2540 = vmatpush1.bf16.msra.mxu1 %v3006_v45  ;;  %v780_v50 = vpop.permute.xlu0 %779  ;;  %v793_v0 = vsel %vm792_vm15, %v774_v37, %v791_v55  ;;  %v4336_v9 = vpop.permute.xlu1 %1441 }
 0x1af   : > { %v788_v57 = vrot.slane %v780_v50, 4  ;;  %v5084_v12 = vrot.slane %v4336_v9, 4 }
 0x1b0   : > { %1155 = vrot.lane.b32.xlu0 %v4055_v18, %s3550_s7  ;;  %877 = vrot.lane.b32.xlu1 %v860_v61, %s3532_s11 }
 0x1b1   : > { %v796_v59 = vsel %vm602_vm6, %v788_v57, %v5117_v56  ;;  %v813_v57 = vld [vmem:[#allocation2 + $0x28] sm:$0xf] }
 0x1b2   : > { %v797_v1 = vsel %vm792_vm15, %v780_v50, %v796_v59  ;;  %v1440_v10 = vpop.permute.xlu0 %1439  ;;  %v4341_v20 = vpop.permute.xlu1 %1447  ;;  %v810_v59 = vld [vmem:[#allocation2 + $0x10] sm:$0xf] }
 0x1b3   : > { %v1451_v14 = vrot.slane %v1440_v10, 4  ;;  %v2943_v19 = vcombine.high %v793_v0, %v797_v1  ;;  %v2942_v4 = vcombine.low %v793_v0, %v797_v1  ;;  %v5085_v25 = vrot.slane %v4341_v20, 4 }
 0x1b4   : > { %871 = vrot.lane.b32.xlu0 %v857_v63, %s3532_s11  ;;  %1104 = vrot.lane.b32.xlu1 %v4039_v13, %s3551_s12  ;;  %s3552_s11 = smov 10  }
 0x1b5   : > { %2496 = vmatprep.subr.bf16.mxu0 %v2943_v19  ;;  %v1457_v24 = vsel %vm602_vm6, %v1451_v14, %v5084_v12 }
 0x1b6   : > { %2497 = vmatpush1.bf16.msra.mxu0 %v2942_v4  ;;  %v1446_v22 = vpop.permute.xlu0 %1445  ;;  %v1459_v5 = vsel %vm5114_vm0, %v1440_v10, %v1457_v24  ;;  %v4356_v37 = vpop.permute.xlu1 %728 }
 0x1b7   : > { %v1454_v31 = vrot.slane %v1446_v22, 4  ;;  %v5111_v42 = vrot.slane %v4356_v37, 4 }
 0x1b8   : > { %1102 = vrot.lane.b32.xlu0 %v4049_v17, %s3551_s12  ;;  %1110 = vrot.lane.b32.xlu1 %v4043_v16, %s3551_s12 }
 0x1b9   : > { %v1462_v3 = vsel %vm602_vm6, %v1454_v31, %v5085_v25  ;;  %v716_v25 = vld [vmem:[#allocation2 + $0x10] sm:$0xf] }
 0x1ba   : > { %v1463_v34 = vsel %vm5114_vm0, %v1446_v22, %v1462_v3  ;;  %v727_v41 = vpop.permute.xlu0 %726  ;;  %v4363_v61 = vpop.permute.xlu1 %734  ;;  %vm5119_vm0 = vcmask 146432  }
 0x1bb   : > { %v738_v45 = vrot.slane %v727_v41, 4  ;;  %v3003_v50 = vcombine.high %v1459_v5, %v1463_v34  ;;  %v3002_v55 = vcombine.low %v1459_v5, %v1463_v34  ;;  %v5112_v1 = vrot.slane %v4363_v61, 4 }
 0x1bc   : > { %1108 = vrot.lane.b32.xlu0 %v4055_v18, %s3551_s12  ;;  %830 = vrot.lane.b32.xlu1 %v813_v57, %s3534_s27 }
 0x1bd   : > { %2541 = vmatprep.subr.bf16.mxu1 %v3003_v50  ;;  %v744_v0 = vsel %vm602_vm6, %v738_v45, %v5111_v42 }
 0x1be   : > { %2542 = vmatpush1.bf16.msra.mxu1 %v3002_v55  ;;  %v733_v63 = vpop.permute.xlu0 %732  ;;  %v746_v19 = vsel %vm745_vm1, %v727_v41, %v744_v0  ;;  %v4376_v22 = vpop.permute.xlu1 %1394  ;;  %v763_v0 = vld [vmem:[#allocation2 + $0x10] sm:$0xf] }
 0x1bf   : > { %v741_v10 = vrot.slane %v733_v63, 4  ;;  %v5082_v31 = vrot.slane %v4376_v22, 4 }
 0x1c0   : > { %824 = vrot.lane.b32.xlu0 %v810_v59, %s3534_s27  ;;  %1057 = vrot.lane.b32.xlu1 %v4039_v13, %s3552_s11  ;;  %s3553_s27 = smov 11  }
 0x1c1   : > { %v749_v14 = vsel %vm602_vm6, %v741_v10, %v5112_v1 }
 0x1c2   : > { %v750_v4 = vsel %vm745_vm1, %v733_v63, %v749_v14  ;;  %v1393_v24 = vpop.permute.xlu0 %1392  ;;  %v4383_v45 = vpop.permute.xlu1 %1400  ;;  %v766_v63 = vld [vmem:[#allocation2 + $0x28] sm:$0xf] }
 0x1c3   : > { %v1404_v3 = vrot.slane %v1393_v24, 4  ;;  %v2939_v5 = vcombine.high %v746_v19, %v750_v4  ;;  %v2938_v34 = vcombine.low %v746_v19, %v750_v4  ;;  %v5083_v55 = vrot.slane %v4383_v45, 4 }
 0x1c4   : > { %1055 = vrot.lane.b32.xlu0 %v4049_v17, %s3552_s11  ;;  %1063 = vrot.lane.b32.xlu1 %v4043_v16, %s3552_s11 }
 0x1c5   : > { %2498 = vmatprep.subr.bf16.mxu0 %v2939_v5  ;;  %v1410_v50 = vsel %vm602_vm6, %v1404_v3, %v5082_v31 }
 0x1c6   : > { %2499 = vmatpush1.bf16.msra.mxu0 %v2938_v34  ;;  %v1399_v41 = vpop.permute.xlu0 %1398  ;;  %v1412_v10 = vsel %vm5104_vm2, %v1393_v24, %v1410_v50  ;;  %v4398_v19 = vpop.permute.xlu1 %681 }
 0x1c7   : > { %v1407_v57 = vrot.slane %v1399_v41, 4  ;;  %v5106_v3 = vrot.slane %v4398_v19, 4 }
 0x1c8   : > { %1061 = vrot.lane.b32.xlu0 %v4055_v18, %s3552_s11  ;;  %783 = vrot.lane.b32.xlu1 %v766_v63, %s3536_s4 }
 0x1c9   : > { %v1415_v59 = vsel %vm602_vm6, %v1407_v57, %v5083_v55 }
 0x1ca   : > { %v1416_v14 = vsel %vm5104_vm2, %v1399_v41, %v1415_v59  ;;  %v680_v4 = vpop.permute.xlu0 %679  ;;  %v4403_v57 = vpop.permute.xlu1 %687  ;;  %vm5109_vm2 = vcmask 138240  }
 0x1cb   : > { %v691_v5 = vrot.slane %v680_v4, 4  ;;  %v2999_v34 = vcombine.high %v1412_v10, %v1416_v14  ;;  %v2998_v31 = vcombine.low %v1412_v10, %v1416_v14  ;;  %v5107_v41 = vrot.slane %v4403_v57, 4 }
 0x1cc   : > { %777 = vrot.lane.b32.xlu0 %v763_v0, %s3536_s4  ;;  %1010 = vrot.lane.b32.xlu1 %v4039_v13, %s3553_s27  ;;  %s3554_s4 = smov 89  }
 0x1cd   : > { %2543 = vmatprep.subr.bf16.mxu1 %v2999_v34  ;;  %v697_v24 = vsel %vm602_vm6, %v691_v5, %v5106_v3 }
 0x1ce   : > { %2544 = vmatpush1.bf16.msra.mxu1 %v2998_v31  ;;  %v686_v55 = vpop.permute.xlu0 %685  ;;  %v699_v59 = vsel %vm698_vm3, %v680_v4, %v697_v24  ;;  %v4418_v0 = vpop.permute.xlu1 %1347 }
 0x1cf   : > { %v694_v50 = vrot.slane %v686_v55, 4  ;;  %v5088_v14 = vrot.slane %v4418_v0, 4 }
 0x1d0   : > { %1008 = vrot.lane.b32.xlu0 %v4049_v17, %s3553_s27  ;;  %1016 = vrot.lane.b32.xlu1 %v4043_v16, %s3553_s27 }
 0x1d1   : > { %v702_v31 = vsel %vm602_vm6, %v694_v50, %v5107_v41  ;;  %v719_v50 = vld [vmem:[#allocation2 + $0x28] sm:$0xf] }
 0x1d2   : > { %v703_v63 = vsel %vm698_vm3, %v686_v55, %v702_v31  ;;  %v1346_v10 = vpop.permute.xlu0 %1345  ;;  %v4425_v4 = vpop.permute.xlu1 %1353 }
 0x1d3   : > { %v1357_v5 = vrot.slane %v1346_v10, 4  ;;  %v2935_v34 = vcombine.high %v699_v59, %v703_v63  ;;  %v2934_v12 = vcombine.low %v699_v59, %v703_v63  ;;  %v5091_v31 = vrot.slane %v4425_v4, 4 }
 0x1d4   : > { %1014 = vrot.lane.b32.xlu0 %v4055_v18, %s3553_s27  ;;  %736 = vrot.lane.b32.xlu1 %v719_v50, %s3538_s8 }
 0x1d5   : > { %2500 = vmatprep.subr.bf16.mxu0 %v2935_v34  ;;  %v1363_v24 = vsel %vm602_vm6, %v1357_v5, %v5088_v14 }
 0x1d6   : > { %2501 = vmatpush1.bf16.msra.mxu0 %v2934_v12  ;;  %v1352_v55 = vpop.permute.xlu0 %1351  ;;  %v1365_v34 = vsel %vm5093_vm4, %v1346_v10, %v1363_v24  ;;  %v4438_v6 = vpop.permute.xlu1 %634 }
 0x1d7   : > { %v1360_v59 = vrot.slane %v1352_v55, 4  ;;  %v5096_v5 = vrot.slane %v4438_v6, 4 }
 0x1d8   : > { %730 = vrot.lane.b32.xlu0 %v716_v25, %s3538_s8  ;;  %963 = vrot.lane.b32.xlu1 %v4039_v13, %s3554_s4  ;;  %v4455_v13 = vld [vmem:[#allocation13 + $0x4] ss:$16 sps:$4 sm:$0xff]  }
 0x1d9   : > { %v1368_v63 = vsel %vm602_vm6, %v1360_v59, %v5091_v31  ;;  %2522 = vmatprep.mubr.bf16.mxu0 %v4455_v13 }
 0x1da   : > { %v1369_v12 = vsel %vm5093_vm4, %v1352_v55, %v1368_v63  ;;  %v633_v27 = vpop.permute.xlu0 %632  ;;  %v4445_v25 = vpop.permute.xlu1 %640  ;;  %vm5099_vm4 = vcmask 965632  }
 0x1db   : > { %v644_v14 = vrot.slane %v633_v27, 4  ;;  %v2995_v30 = vcombine.high %v1365_v34, %v1369_v12  ;;  %v2994_v40 = vcombine.low %v1365_v34, %v1369_v12  ;;  %v5097_v55 = vrot.slane %v4445_v25, 4 }
 0x1dc   : > { %961 = vrot.lane.b32.xlu0 %v4049_v17, %s3554_s4  ;;  %969 = vrot.lane.b32.xlu1 %v4043_v16, %s3554_s4 }
 0x1dd   : > { %2545 = vmatprep.subr.bf16.mxu1 %v2995_v30  ;;  %v650_v50 = vsel %vm602_vm6, %v644_v14, %v5096_v5  ;;  %v672_v30 = vld [vmem:[#allocation2 + $0x28] sm:$0xf] }
 0x1de   : > { %2546 = vmatpush1.bf16.msra.mxu1 %v2994_v40  ;;  %v639_v10 = vpop.permute.xlu0 %638  ;;  %v669_v40 = vld [vmem:[#allocation2 + $0x10] sm:$0xf]  ;;  %v652_v59 = vsel %vm651_vm5, %v633_v27, %v650_v50  ;;  %v4462_v63 = vpop.permute.xlu1 %1300 }
 0x1df   : > { %v647_v24 = vrot.slane %v639_v10, 4  ;;  %v5095_v16 = vrot.slane %v4462_v63, 4 }
 0x1e0   : > { %967 = vrot.lane.b32.xlu0 %v4055_v18, %s3554_s4  ;;  %689 = vrot.lane.b32.xlu1 %v672_v30, %s3540_s20 }
 0x1e1   : > { %v655_v17 = vsel %vm602_vm6, %v647_v24, %v5097_v55  ;;  %v1620_v24 = vld [vmem:[#allocation2 + $0x2c] sm:$0xf] }
 0x1e2   : > { %v656_v14 = vsel %vm651_vm5, %v639_v10, %v655_v17  ;;  %v1299_v34 = vpop.permute.xlu0 %1298  ;;  %v4468_v27 = vpop.permute.xlu1 %1306 }
 0x1e3   : > { %v1310_v18 = vrot.slane %v1299_v34, 4  ;;  %v2931_v12 = vcombine.high %v652_v59, %v656_v14  ;;  %v2930_v31 = vcombine.low %v652_v59, %v656_v14  ;;  %v5098_v17 = vrot.slane %v4468_v27, 4  ;;  %v622_v59 = vld [vmem:[#allocation2 + $0x10] sm:$0xf] }
 0x1e4   : > { %683 = vrot.lane.b32.xlu0 %v669_v40, %s3540_s20  ;;  %1637 = vrot.lane.b32.xlu1 %v1620_v24, %s3529_s19  ;;  %v625_v40 = vld [vmem:[#allocation2 + $0x28] sm:$0xf]  ;;  %s2920_s20 = sshll.u32 %s3961_s24, 6 }
 0x1e5   : > { %2502 = vmatprep.subr.bf16.mxu0 %v2931_v12  ;;  %v1316_v50 = vsel %vm602_vm6, %v1310_v18, %v5095_v16 }
 0x1e6   : > { %2503 = vmatpush1.bf16.msra.mxu0 %v2930_v31  ;;  %v1305_v10 = vpop.permute.xlu0 %1304  ;;  %v1318_v31 = vsel %vm5099_vm4, %v1299_v34, %v1316_v50  ;;  %v4481_v12 = vpop.permute.xlu1 %586 }
 0x1e7   : > { %v1313_v54 = vrot.slane %v1305_v10, 4  ;;  %v5100_v16 = vrot.slane %v4481_v12, 4 }
 0x1e8   : > { %1631 = vrot.lane.b32.xlu0 %v1617_v46, %s3529_s19  ;;  %642 = vrot.lane.b32.xlu1 %v625_v40, %s3542_s0  ;;  %v1573_v46 = vld [vmem:[#allocation2 + $0x2c] sm:$0xf]  ;;  %v577_v40 = vld [vmem:[#allocation2 + $0x28] sm:$0xf]  ;;  %s5207_s19 = smov 19  }
 0x1e9   : > { %v1321_v30 = vsel %vm602_vm6, %v1313_v54, %v5098_v17  ;;  %v1570_v54 = vld [vmem:[#allocation2 + $0x14] sm:$0xf] }
 0x1ea   : > { %v1322_v14 = vsel %vm5099_vm4, %v1305_v10, %v1321_v30  ;;  %v585_v18 = vpop.permute.xlu0 %584  ;;  %v4486_v17 = vpop.permute.xlu1 %592  ;;  %vm604_vm4 = vcmask 908288  }
 0x1eb   : > { %v596_v5 = vrot.slane %v585_v18, 4  ;;  %v2991_v55 = vcombine.high %v1318_v31, %v1322_v14  ;;  %v2990_v24 = vcombine.low %v1318_v31, %v1322_v14  ;;  %v5103_v50 = vrot.slane %v4486_v17, 4 }
 0x1ec   : > { %636 = vrot.lane.b32.xlu0 %v622_v59, %s3542_s0  ;;  %1590 = vrot.lane.b32.xlu1 %v1573_v46, %s3530_s26  ;;  %v574_v59 = vld [vmem:[#allocation2 + $0x10] sm:$0xf] }
 0x1ed   : > { %2547 = vmatprep.subr.bf16.mxu1 %v2991_v55  ;;  %v603_v10 = vsel %vm602_vm6, %v596_v5, %v5100_v16 }
 0x1ee   : > { %2548 = vmatpush1.bf16.msra.mxu1 %v2990_v24  ;;  %v591_v34 = vpop.permute.xlu0 %590  ;;  %v605_v31 = vsel %vm604_vm4, %v585_v18, %v603_v10  ;;  %v4499_v24 = vpop.permute.xlu1 %1770 }
 0x1ef   : > { %v599_v30 = vrot.slane %v591_v34, 4  ;;  %v5105_v32 = vrot.slane %v4499_v24, 4 }
 0x1f0   : > { %1584 = vrot.lane.b32.xlu0 %v1570_v54, %s3530_s26  ;;  %594 = vrot.lane.b32.xlu1 %v577_v40, %s3544_s15  ;;  %v1526_v54 = vld [vmem:[#allocation2 + $0x2c] sm:$0xf] }
 0x1f1   : > { %v608_v55 = vsel %vm602_vm6, %v599_v30, %v5103_v50  ;;  %v1523_v30 = vld [vmem:[#allocation2 + $0x14] sm:$0xf]  ;;  %v1244_v40 = vld [vmem:[#allocation2 + $0x2c] sm:$0xf] }
 0x1f2   : > { %v609_v14 = vsel %vm604_vm4, %v591_v34, %v608_v55  ;;  %v1769_v5 = vpop.permute.xlu0 %1768  ;;  %v4504_v50 = vpop.permute.xlu1 %1776 }
 0x1f3   : > { %v2926_v16 = vcombine.low %v605_v31, %v609_v14  ;;  %v2927_v33 = vcombine.high %v605_v31, %v609_v14  ;;  %v1780_v46 = vrot.slane %v1769_v5, 4  ;;  %v5108_v10 = vrot.slane %v4504_v50, 4 }
 0x1f4   : > { %588 = vrot.lane.b32.xlu0 %v574_v59, %s3544_s15  ;;  %1543 = vrot.lane.b32.xlu1 %v1526_v54, %s3533_s2  ;;  %v1241_v59 = vld [vmem:[#allocation2 + $0x14] sm:$0xf] }
 0x1f5   : > { %2504 = vmatprep.subr.bf16.mxu0 %v2927_v33  ;;  %v1786_v34 = vsel %vm602_vm6, %v1780_v46, %v5105_v32 }
 0x1f6   : > { %2505 = vmatpush1.bf16.msra.mxu0 %v2926_v16  ;;  %v1775_v18 = vpop.permute.xlu0 %1774  ;;  %v1788_v16 = vsel %vm5109_vm2, %v1769_v5, %v1786_v34  ;;  %v4517_v14 = vpop.permute.xlu1 %1253 }
 0x1f7   : > { %v1783_v55 = vrot.slane %v1775_v18, 4  ;;  %v5110_v41 = vrot.slane %v4517_v14, 4 }
 0x1f8   : > { %1537 = vrot.lane.b32.xlu0 %v1523_v30, %s3533_s2  ;;  %1261 = vrot.lane.b32.xlu1 %v1244_v40, %s3546_s22  ;;  %v1479_v30 = vld [vmem:[#allocation2 + $0x2c] sm:$0xf] }
 0x1f9   : > { %v1791_v33 = vsel %vm602_vm6, %v1783_v55, %v5108_v10  ;;  %v1476_v55 = vld [vmem:[#allocation2 + $0x14] sm:$0xf]  ;;  %v1197_v40 = vld [vmem:[#allocation2 + $0x2c] sm:$0xf] }
 0x1fa   : > { %v1792_v31 = vsel %vm5109_vm2, %v1775_v18, %v1791_v33  ;;  %v1252_v46 = vpop.permute.xlu0 %1251  ;;  %v4522_v10 = vpop.permute.xlu1 %1259  ;;  %vm1270_vm2 = vcmask 973824  }
 0x1fb   : > { %v3030_v32 = vcombine.low %v1788_v16, %v1792_v31  ;;  %v3031_v3 = vcombine.high %v1788_v16, %v1792_v31  ;;  %v1263_v54 = vrot.slane %v1252_v46, 4  ;;  %v5113_v34 = vrot.slane %v4522_v10, 4 }
 0x1fc   : > { %1255 = vrot.lane.b32.xlu0 %v1241_v59, %s3546_s22  ;;  %1496 = vrot.lane.b32.xlu1 %v1479_v30, %s3535_s10  ;;  %v1194_v59 = vld [vmem:[#allocation2 + $0x14] sm:$0xf]  ;;  %s5273_s22 = sld [smem:[#allocation43_spill]] }
 0x1fd   : > { %2559 = vmatprep.subr.bf16.mxu1 %v3031_v3  ;;  %v1269_v18 = vsel %vm602_vm6, %v1263_v54, %v5110_v41 }
 0x1fe   : > { %2560 = vmatpush2.bf16.msra.mxu1 %v3030_v32  ;;  %v1258_v5 = vpop.permute.xlu0 %1257  ;;  %v1271_v32 = vsel %vm1270_vm2, %v1252_v46, %v1269_v18  ;;  %v4535_v31 = vpop.permute.xlu1 %1723 }
 0x1ff   : > { %v1266_v33 = vrot.slane %v1258_v5, 4  ;;  %v5115_v1 = vrot.slane %v4535_v31, 4 }
 0x200   : > { %1490 = vrot.lane.b32.xlu0 %v1476_v55, %s3535_s10  ;;  %1214 = vrot.lane.b32.xlu1 %v1197_v40, %s3548_s3  ;;  %v1432_v55 = vld [vmem:[#allocation2 + $0x2c] sm:$0xf]  ;;  %s5210_s10 = sld [smem:[#allocation42_spill]] }
 0x201   : > { %v1274_v3 = vsel %vm602_vm6, %v1266_v33, %v5113_v34  ;;  %v1429_v33 = vld [vmem:[#allocation2 + $0x14] sm:$0xf]  ;;  %v1385_v40 = vld [vmem:[#allocation2 + $0x2c] sm:$0xf] }
 0x202   : > { %v1275_v16 = vsel %vm1270_vm2, %v1258_v5, %v1274_v3  ;;  %v1722_v54 = vpop.permute.xlu0 %1721  ;;  %v4540_v34 = vpop.permute.xlu1 %1729 }
 0x203   : > { %v2986_v41 = vcombine.low %v1271_v32, %v1275_v16  ;;  %v2987_v42 = vcombine.high %v1271_v32, %v1275_v16  ;;  %v1733_v30 = vrot.slane %v1722_v54, 4  ;;  %v5118_v18 = vrot.slane %v4540_v34, 4 }
 0x204   : > { %1208 = vrot.lane.b32.xlu0 %v1194_v59, %s3548_s3  ;;  %1449 = vrot.lane.b32.xlu1 %v1432_v55, %s3537_s30  ;;  %v1382_v59 = vld [vmem:[#allocation2 + $0x14] sm:$0xf]  ;;  %s2701_s3 = scalar_lea.sflag [#allocation6], %s3961_s24 }
 0x205   : > { %2506 = vmatprep.subr.bf16.mxu0 %v2987_v42  ;;  %v1739_v5 = vsel %vm602_vm6, %v1733_v30, %v5115_v1 }
 0x206   : > { %2507 = vmatpush2.bf16.msra.mxu0 %v2986_v41  ;;  %v1728_v46 = vpop.permute.xlu0 %1727  ;;  %v1741_v41 = vsel %vm5119_vm0, %v1722_v54, %v1739_v5  ;;  %v4553_v16 = vpop.permute.xlu1 %1206  ;;  %s5211_s8 = smov %s5210_s10 }
 0x207   : > { %v1736_v3 = vrot.slane %v1728_v46, 4  ;;  %v5120_v56 = vrot.slane %v4553_v16, 4 }
 0x208   : > { %1443 = vrot.lane.b32.xlu0 %v1429_v33, %s3537_s30  ;;  %1402 = vrot.lane.b32.xlu1 %v1385_v40, %s3539_s18  ;;  %v1142_v33 = vld [vmem:[#allocation2 + $0x28] sm:$0xf]  ;;  %v1338_v40 = vld [vmem:[#allocation2 + $0x2c] sm:$0xf] }
 0x209   : > { %v1744_v42 = vsel %vm602_vm6, %v1736_v3, %v5118_v18  ;;  %v1139_v3 = vld [vmem:[#allocation2 + $0x10] sm:$0xf] }
 0x20a   : > { %v1745_v32 = vsel %vm5119_vm0, %v1728_v46, %v1744_v42  ;;  %v1205_v30 = vpop.permute.xlu0 %1204  ;;  %v4558_v18 = vpop.permute.xlu1 %1212  ;;  %vm5125_vm0 = vcmask 1039360  }
 0x20b   : > { %v3026_v1 = vcombine.low %v1741_v41, %v1745_v32  ;;  %v3027_v38 = vcombine.high %v1741_v41, %v1745_v32  ;;  %v1216_v55 = vrot.slane %v1205_v30, 4  ;;  %v5124_v5 = vrot.slane %v4558_v18, 4 }
 0x20c   : > { %1396 = vrot.lane.b32.xlu0 %v1382_v59, %s3539_s18  ;;  %1159 = vrot.lane.b32.xlu1 %v1142_v33, %s3550_s7  ;;  %v1335_v59 = vld [vmem:[#allocation2 + $0x14] sm:$0xf] }
 0x20d   : > { %2561 = vmatprep.subr.bf16.mxu1 %v3027_v38  ;;  %v1222_v46 = vsel %vm602_vm6, %v1216_v55, %v5120_v56 }
 0x20e   : > { %2562 = vmatpush2.bf16.msra.mxu1 %v3026_v1  ;;  %v1211_v54 = vpop.permute.xlu0 %1210  ;;  %v1224_v1 = vsel %vm5125_vm0, %v1205_v30, %v1222_v46  ;;  %v4571_v32 = vpop.permute.xlu1 %1676 }
 0x20f   : > { %v1219_v42 = vrot.slane %v1211_v54, 4  ;;  %v5127_v62 = vrot.slane %v4571_v32, 4 }
 0x210   : > { %1153 = vrot.lane.b32.xlu0 %v1139_v3, %s3550_s7  ;;  %1355 = vrot.lane.b32.xlu1 %v1338_v40, %s3541_s23  ;;  %v1095_v3 = vld [vmem:[#allocation2 + $0x28] sm:$0xf]  ;;  %v1288_v40 = vld [vmem:[#allocation2 + $0x14] sm:$0xf] }
 0x211   : > { %v1227_v38 = vsel %vm602_vm6, %v1219_v42, %v5124_v5  ;;  %v1092_v42 = vld [vmem:[#allocation2 + $0x10] sm:$0xf] }
 0x212   : > { %v1228_v41 = vsel %vm5125_vm0, %v1211_v54, %v1227_v38  ;;  %v1675_v55 = vpop.permute.xlu0 %1674  ;;  %v4576_v5 = vpop.permute.xlu1 %1682  ;;  %v3206_v54 = vld [vmem:[#allocation2 + $0x4] ss:$24 sps:$4 sm:$0xff]   ;;  %vm5131_vm0 = vcmask 154624  }
 0x213   : > { %v2982_v56 = vcombine.low %v1224_v1, %v1228_v41  ;;  %v2983_v53 = vcombine.high %v1224_v1, %v1228_v41  ;;  %v1686_v33 = vrot.slane %v1675_v55, 4  ;;  %v5130_v38 = vrot.slane %v4576_v5, 4 }
 0x214   : > { %1349 = vrot.lane.b32.xlu0 %v1335_v59, %s3541_s23  ;;  %1112 = vrot.lane.b32.xlu1 %v1095_v3, %s3551_s12  ;;  %v5203_v3 = vrot.slane %v4189_v43, 4  ;;  %s3037_s23 = sshll.u32 %s3771_s13, 9 }
 0x215   : > { %2508 = vmatprep.subr.bf16.mxu0 %v2983_v53  ;;  %v1692_v46 = vsel %vm602_vm6, %v1686_v33, %v5127_v62 }
 0x216   : > { %2509 = vmatpush2.bf16.msra.mxu0 %v2982_v56  ;;  %v1681_v30 = vpop.permute.xlu0 %1680  ;;  %v1291_v56 = vld [vmem:[#allocation2 + $0x2c] sm:$0xf]  ;;  %v1694_v59 = vsel %vm5131_vm0, %v1675_v55, %v1692_v46  ;;  %v925_v21 = vpop.permute.xlu1 %924  ;;  %v1045_v46 = vld [vmem:[#allocation2 + $0x10] sm:$0xf] }
 0x217   : > { %v1689_v1 = vrot.slane %v1681_v30, 4  ;;  %2510 = vmatprep.subr.bf16.mxu0 %v3204_v8  ;;  %v931_v8 = vrot.slane %v925_v21, 4 }
 0x218   : > { %1106 = vrot.lane.b32.xlu0 %v1092_v42, %s3551_s12  ;;  %1308 = vrot.lane.b32.xlu1 %v1291_v56, %s3543_s29  ;;  %s3555_s12 = smov [#allocation15]  }
 0x219   : > { %v1697_v53 = vsel %vm602_vm6, %v1689_v1, %v5130_v38  ;;  %v939_v42 = vsel %vm602_vm6, %v5203_v3, %v931_v8  ;;  %v5204_v1 = vrot.slane %v4183_v39, 4 }
 0x21a   : > { %v1698_v41 = vsel %vm5131_vm0, %v1681_v30, %v1697_v53  ;;  %v919_v33 = vpop.permute.xlu0 %918  ;;  %2511 = vmatpush2.bf16.msra.mxu0 %v3206_v54  ;;  %v1048_v30 = vld [vmem:[#allocation2 + $0x28] sm:$0xf]  ;;  %v4599_v53 = vpop.permute.xlu1 %1151  ;;  %vm1121_vm0 = vcmask 72704  }
 0x21b   : > { %v3022_v62 = vcombine.low %v1694_v59, %v1698_v41  ;;  %v3023_v49 = vcombine.high %v1694_v59, %v1698_v41  ;;  %v928_v51 = vrot.slane %v919_v33, 4  ;;  %v4597_v54 = vld [vmem:[#allocation13 + $0x8] ss:$16 sps:$4 sm:$0xff]   ;;  %v5133_v59 = vrot.slane %v4599_v53, 4 }
 0x21c   : > { %1302 = vrot.lane.b32.xlu0 %v1288_v40, %s3543_s29  ;;  %v940_v40 = vsel %vm933_vm8, %v4189_v43, %v939_v42  ;;  %1065 = vrot.lane.b32.xlu1 %v1048_v30, %s3552_s11  ;;  %v998_v30 = vld [vmem:[#allocation2 + $0x10] sm:$0xf]  ;;  %s5272_s29 = sld [smem:[#allocation34_spill]] }
 0x21d   : > { %v935_v55 = vsel %vm602_vm6, %v5204_v1, %v928_v51  ;;  %2563 = vmatprep.subr.bf16.mxu1 %v3023_v49  ;;  %v1761_v49 = vld [vmem:[#allocation2 + $0x2c] sm:$0xf] }
 0x21e   : > { %2564 = vmatpush2.bf16.msra.mxu1 %v3022_v62  ;;  %v1150_v21 = vpop.permute.xlu0 %1149  ;;  %v936_v56 = vsel %vm933_vm8, %v4183_v39, %v935_v55  ;;  %v1758_v62 = vld [vmem:[#allocation2 + $0x14] sm:$0xf]  ;;  %v4609_v8 = vpop.permute.xlu1 %1157  ;;  %vm1168_vm8 = vcmask 7168   ;;  %v1001_v55 = vld [vmem:[#allocation2 + $0x28] sm:$0xf] }
 0x21f   : > { %v1161_v41 = vrot.slane %v1150_v21, 4  ;;  %v2956_v33 = vcombine.low %v936_v56, %v940_v40  ;;  %v2957_v51 = vcombine.high %v936_v56, %v940_v40  ;;  %v1165_v3 = vrot.slane %v4609_v8, 4 }
 0x220   : > { %1059 = vrot.lane.b32.xlu0 %v1045_v46, %s3552_s11  ;;  %1778 = vrot.lane.b32.xlu1 %v1761_v49, %s3545_s17  ;;  %v5205_v49 = vrot.slane %v4234_v15, 4  ;;  %s3388_s11 = sshll.u32 %s3555_s12, 4  ;;  %s3389_s11 = int_to_ptr.vmem [resolvable:$false] %s3388_s11 }
 0x221   : > { %2576 = vmatprep.subr.bf16.mxu1 %v2957_v51  ;;  %2566 = vmatmul.mubr.bf16.vlgmr.msra.gmra.mxu1 %v4597_v54  ;;  %v1167_v43 = vsel %vm602_vm6, %v1161_v41, %v5133_v59 }
 0x222   : > { %2577 = vmatpush1.bf16.msra.mxu1 %v2956_v33  ;;  %v1156_v39 = vpop.permute.xlu0 %1155  ;;  %2608 = vmatprep.mubr.bf16.mxu1 %v4455_v13  ;;  %v1169_v13 = vsel %vm1168_vm8, %v1150_v21, %v1167_v43  ;;  %v878_v56 = vpop.permute.xlu1 %877  ;;  %v1711_v43 = vld [vmem:[#allocation2 + $0x14] sm:$0xf]  ;;  %p5274_p6 = scmp.ne.s32.totalorder %s5272_s29, 0 }
 0x223   : > { %v1164_v42 = vrot.slane %v1156_v39, 4  ;;  %v884_v51 = vrot.slane %v878_v56, 4 }
 0x224   : > { %1772 = vrot.lane.b32.xlu0 %v1758_v62, %s3545_s17  ;;  %1018 = vrot.lane.b32.xlu1 %v1001_v55, %s3553_s27 }
 0x225   : > { %v1172_v1 = vsel %vm602_vm6, %v1164_v42, %v1165_v3  ;;  %v892_v62 = vsel %vm602_vm6, %v5205_v49, %v884_v51  ;;  %v5206_v42 = vrot.slane %v4223_v60, 4 }
 0x226   : > { %v1173_v46 = vsel %vm1168_vm8, %v1156_v39, %v1172_v1  ;;  %v872_v40 = vpop.permute.xlu0 %871  ;;  %v1714_v39 = vld [vmem:[#allocation2 + $0x2c] sm:$0xf]  ;;  %v4631_v1 = vpop.permute.xlu1 %1104 }
 0x227   : > { %v2974_v41 = vcombine.low %v1169_v13, %v1173_v46  ;;  %v2975_v33 = vcombine.high %v1169_v13, %v1173_v46  ;;  %v881_v38 = vrot.slane %v872_v40, 4  ;;  %v5132_v46 = vrot.slane %v4631_v1, 4 }
 0x228   : > { %1012 = vrot.lane.b32.xlu0 %v998_v30, %s3553_s27  ;;  %v893_v30 = vsel %vm886_vm10, %v4234_v15, %v892_v62  ;;  %1731 = vrot.lane.b32.xlu1 %v1714_v39, %s3547_s6  ;;  %v1664_v39 = vld [vmem:[#allocation2 + $0x14] sm:$0xf]  ;;  %s3390_s27 = scalar_lea.vmem %s3389_s11, 2048 }
 0x229   : > { %v888_v21 = vsel %vm602_vm6, %v5206_v42, %v881_v38  ;;  %2512 = vmatprep.subr.bf16.mxu0 %v2975_v33  ;;  %v954_v38 = vld [vmem:[#allocation2 + $0x28] sm:$0xf]  ;;  %v951_v33 = vld [vmem:[#allocation2 + $0x10] sm:$0xf] }
 0x22a   : > { %2513 = vmatpush2.bf16.msra.mxu0 %v2974_v41  ;;  %v1103_v13 = vpop.permute.xlu0 %1102  ;;  %v889_v55 = vsel %vm886_vm10, %v4223_v60, %v888_v21  ;;  %v4640_v41 = vpop.permute.xlu1 %1110  ;;  %v1667_v21 = vld [vmem:[#allocation2 + $0x2c] sm:$0xf]  ;;  %vm1074_vm10 = vcmask 80896  }
 0x22b   : > { %v1114_v56 = vrot.slane %v1103_v13, 4  ;;  %v2952_v40 = vcombine.low %v889_v55, %v893_v30  ;;  %v2953_v51 = vcombine.high %v889_v55, %v893_v30  ;;  %v5135_v15 = vrot.slane %v4640_v41, 4 }
 0x22c   : > { %1725 = vrot.lane.b32.xlu0 %v1711_v43, %s3547_s6  ;;  %971 = vrot.lane.b32.xlu1 %v954_v38, %s3554_s4  ;;  %v5208_v38 = vrot.slane %v4278_v58, 4  ;;  %s4967_s6 = scalar_lea.hbm %s5273_s22, %s3037_s23 }
 0x22d   : > { %2578 = vmatprep.subr.bf16.mxu1 %v2953_v51  ;;  %v1120_v60 = vsel %vm602_vm6, %v1114_v56, %v5132_v46  ;;  %s4973_s13 = scalar_lea.hbm %s4967_s6, 512 }
 0x22e   : > { %2579 = vmatpush1.bf16.msra.mxu1 %v2952_v40  ;;  %v1109_v49 = vpop.permute.xlu0 %1108  ;;  %v1122_v43 = vsel %vm1121_vm0, %v1103_v13, %v1120_v60  ;;  %v831_v30 = vpop.permute.xlu1 %830  ;;  %v1915_v60 = vld [vmem:[%s5211_s8] sm:$0xff] }
 0x22f   : > { %v1117_v62 = vrot.slane %v1109_v49, 4  ;;  %v837_v46 = vrot.slane %v831_v30, 4 }
 0x230   : > { %965 = vrot.lane.b32.xlu0 %v951_v33, %s3554_s4  ;;  %1684 = vrot.lane.b32.xlu1 %v1667_v21, %s5207_s19 }
 0x231   : > { %v1125_v42 = vsel %vm602_vm6, %v1117_v62, %v5135_v15  ;;  %v845_v33 = vsel %vm602_vm6, %v5208_v38, %v837_v46  ;;  %v5209_v62 = vrot.slane %v4271_v48, 4 }
 0x232   : > { %v1126_v55 = vsel %vm1121_vm0, %v1109_v49, %v1125_v42  ;;  %v825_v40 = vpop.permute.xlu0 %824  ;;  %v1916_v49 = vld [vmem:[%s5210_s10 + $0x8] sm:$0xff]  ;;  %v4667_v42 = vpop.permute.xlu1 %1057 }
 0x233   : > { %v2970_v56 = vcombine.low %v1122_v43, %v1126_v55  ;;  %v2971_v51 = vcombine.high %v1122_v43, %v1126_v55  ;;  %v834_v59 = vrot.slane %v825_v40, 4 }
 0x234   : > { %1678 = vrot.lane.b32.xlu0 %v1664_v39, %s5207_s19  ;;  %v846_v39 = vsel %vm839_vm12, %v4278_v58, %v845_v33  ;;  %1924 = vperm.xlu1 %3200, %v1916_v49  }
 0x235   : > { %v841_v13 = vsel %vm602_vm6, %v5209_v62, %v834_v59  ;;  %2514 = vmatprep.subr.bf16.mxu0 %v2971_v51  ;;  %v5134_v59 = vrot.slane %v4667_v42, 4 }
 0x236   : > { %2515 = vmatpush2.bf16.msra.mxu0 %v2970_v56  ;;  %v1056_v21 = vpop.permute.xlu0 %1055  ;;  %v842_v46 = vsel %vm839_vm12, %v4271_v48, %v841_v13  ;;  %v4674_v40 = vpop.permute.xlu1 %1063  ;;  %vm1027_vm12 = vcmask 89088  }
 0x237   : > { %v1067_v43 = vrot.slane %v1056_v21, 4  ;;  %v2948_v55 = vcombine.low %v842_v46, %v846_v39  ;;  %v2949_v30 = vcombine.high %v842_v46, %v846_v39  ;;  %v5137_v56 = vrot.slane %v4674_v40, 4 }
 0x238   : > { %1919 = vperm.xlu0 %3199, %v1915_v60  }
 0x239   : > { %2580 = vmatprep.subr.bf16.mxu1 %v2949_v30  ;;  %v1073_v48 = vsel %vm602_vm6, %v1067_v43, %v5134_v59  ;;  %v5212_v30 = vrot.slane %v4321_v47, 4  ;;  %v5213_v59 = vrot.slane %v4314_v35, 4 }
 0x23a   : > { %2581 = vmatpush1.bf16.msra.mxu1 %v2948_v55  ;;  %v1062_v51 = vpop.permute.xlu0 %1061  ;;  %v1075_v33 = vsel %vm1074_vm10, %v1056_v21, %v1073_v48  ;;  %v784_v13 = vpop.permute.xlu1 %783 }
 0x23b   : > { %v1070_v58 = vrot.slane %v1062_v51, 4  ;;  %v790_v39 = vrot.slane %v784_v13, 4 }
 0x23d   : > { %v1078_v38 = vsel %vm602_vm6, %v1070_v58, %v5137_v56  ;;  %v798_v43 = vsel %vm602_vm6, %v5212_v30, %v790_v39 }
 0x23e   : > { %v1079_v62 = vsel %vm1074_vm10, %v1062_v51, %v1078_v38  ;;  %v778_v49 = vpop.permute.xlu0 %777  ;;  %v4691_v58 = vpop.permute.xlu1 %1010  ;;  %v799_v48 = vsel %vm792_vm15, %v4321_v47, %v798_v43 }
 0x23f   : > { %v2966_v60 = vcombine.low %v1075_v33, %v1079_v62  ;;  %v2967_v46 = vcombine.high %v1075_v33, %v1079_v62  ;;  %v787_v55 = vrot.slane %v778_v49, 4  ;;  %v5136_v38 = vrot.slane %v4691_v58, 4 }
 0x241   : > { %v794_v15 = vsel %vm602_vm6, %v5213_v59, %v787_v55  ;;  %2516 = vmatprep.subr.bf16.mxu0 %v2967_v46 }
 0x242   : > { %2517 = vmatpush2.bf16.msra.mxu0 %v2966_v60  ;;  %v1009_v21 = vpop.permute.xlu0 %1008  ;;  %v795_v51 = vsel %vm792_vm15, %v4314_v35, %v794_v15  ;;  %v4698_v49 = vpop.permute.xlu1 %1016  ;;  %vm980_vm15 = vcmask 728064  }
 0x243   : > { %v1020_v33 = vrot.slane %v1009_v21, 4  ;;  %v2944_v62 = vcombine.low %v795_v51, %v799_v48  ;;  %v2945_v13 = vcombine.high %v795_v51, %v799_v48  ;;  %v5139_v35 = vrot.slane %v4698_v49, 4 }
 0x245   : > { %2582 = vmatprep.subr.bf16.mxu1 %v2945_v13  ;;  %v1026_v60 = vsel %vm602_vm6, %v1020_v33, %v5136_v38  ;;  %v5214_v13 = vrot.slane %v4363_v61, 4  ;;  %v5215_v38 = vrot.slane %v4356_v37, 4 }
 0x246   : > { %2583 = vmatpush1.bf16.msra.mxu1 %v2944_v62  ;;  %v1015_v59 = vpop.permute.xlu0 %1014  ;;  %v1028_v46 = vsel %vm1027_vm12, %v1009_v21, %v1026_v60  ;;  %v737_v55 = vpop.permute.xlu1 %736 }
 0x247   : > { %v1023_v15 = vrot.slane %v1015_v59, 4  ;;  %v743_v48 = vrot.slane %v737_v55, 4 }
 0x249   : > { %v1031_v47 = vsel %vm602_vm6, %v1023_v15, %v5139_v35  ;;  %v751_v33 = vsel %vm602_vm6, %v5214_v13, %v743_v48 }
 0x24a   : > { %v1032_v39 = vsel %vm1027_vm12, %v1015_v59, %v1031_v47  ;;  %v731_v30 = vpop.permute.xlu0 %730  ;;  %v4715_v15 = vpop.permute.xlu1 %963  ;;  %v752_v60 = vsel %vm745_vm1, %v4363_v61, %v751_v33 }
 0x24b   : > { %v2962_v43 = vcombine.low %v1028_v46, %v1032_v39  ;;  %v2963_v51 = vcombine.high %v1028_v46, %v1032_v39  ;;  %v740_v62 = vrot.slane %v731_v30, 4  ;;  %v5138_v47 = vrot.slane %v4715_v15, 4 }
 0x24d   : > { %v747_v56 = vsel %vm602_vm6, %v5215_v38, %v740_v62  ;;  %2518 = vmatprep.subr.bf16.mxu0 %v2963_v51 }
 0x24e   : > { %2519 = vmatpush2.bf16.msra.mxu0 %v2962_v43  ;;  %v962_v21 = vpop.permute.xlu0 %961  ;;  %v748_v59 = vsel %vm745_vm1, %v4356_v37, %v747_v56  ;;  %v4722_v30 = vpop.permute.xlu1 %969 }
 0x24f   : > { %v973_v46 = vrot.slane %v962_v21, 4  ;;  %v2940_v39 = vcombine.low %v748_v59, %v752_v60  ;;  %v2941_v55 = vcombine.high %v748_v59, %v752_v60  ;;  %v977_v37 = vrot.slane %v4722_v30, 4 }
 0x251   : > { %2584 = vmatprep.subr.bf16.mxu1 %v2941_v55  ;;  %v979_v43 = vsel %vm602_vm6, %v973_v46, %v5138_v47  ;;  %v5216_v55 = vrot.slane %v4403_v57, 4  ;;  %v5217_v47 = vrot.slane %v4398_v19, 4 }
 0x252   : > { %2585 = vmatpush1.bf16.msra.mxu1 %v2940_v39  ;;  %v968_v38 = vpop.permute.xlu0 %967  ;;  %v981_v51 = vsel %vm980_vm15, %v962_v21, %v979_v43  ;;  %v690_v62 = vpop.permute.xlu1 %689 }
 0x253   : > { %v976_v56 = vrot.slane %v968_v38, 4  ;;  %v696_v60 = vrot.slane %v690_v62, 4 }
 0x255   : > { %v984_v61 = vsel %vm602_vm6, %v976_v56, %v977_v37  ;;  %v704_v46 = vsel %vm602_vm6, %v5216_v55, %v696_v60  ;;  %v4739_v56 = vld [vmem:[#allocation13] ss:$16 sps:$4 sm:$0xff]   ;;  %v5218_v60 = vrot.slane %v4165_v28, 4  ;;  %v3213_v55 = vld [vmem:[#allocation13 + $0xc] ss:$16 sps:$4 sm:$0xff]  }
 0x256   : > { %v985_v48 = vsel %vm980_vm15, %v968_v38, %v984_v61  ;;  %v684_v13 = vpop.permute.xlu0 %683  ;;  %v1638_v21 = vpop.permute.xlu1 %1637  ;;  %v705_v61 = vsel %vm698_vm3, %v4403_v57, %v704_v46 }
 0x257   : > { %v2958_v33 = vcombine.low %v981_v51, %v985_v48  ;;  %v2959_v59 = vcombine.high %v981_v51, %v985_v48  ;;  %v693_v39 = vrot.slane %v684_v13, 4  ;;  %v1644_v51 = vrot.slane %v1638_v21, 4 }
 0x259   : > { %v700_v35 = vsel %vm602_vm6, %v5217_v47, %v693_v39  ;;  %2520 = vmatprep.subr.bf16.mxu0 %v2959_v59  ;;  %v1652_v47 = vsel %vm602_vm6, %v5218_v60, %v1644_v51  ;;  %v5219_v59 = vrot.slane %v4167_v29, 4 }
 0x25a   : > { %2521 = vmatpush2.bf16.msra.mxu0 %v2958_v33  ;;  %v1632_v38 = vpop.permute.xlu0 %1631  ;;  %v701_v43 = vsel %vm698_vm3, %v4398_v19, %v700_v35  ;;  %v643_v33 = vpop.permute.xlu1 %642  ;;  %v1653_v35 = vsel %vm1646_vm7, %v4165_v28, %v1652_v47 }
 0x25b   : > { %v1641_v48 = vrot.slane %v1632_v38, 4  ;;  %v2936_v62 = vcombine.low %v701_v43, %v705_v61  ;;  %v2937_v13 = vcombine.high %v701_v43, %v705_v61  ;;  %v649_v46 = vrot.slane %v643_v33, 4 }
 0x25c   : > { %v5220_v61 = vrot.slane %v4445_v25, 4 }
 0x25d   : > { %v1648_v39 = vsel %vm602_vm6, %v5219_v59, %v1641_v48  ;;  %2586 = vmatprep.subr.bf16.mxu1 %v2937_v13  ;;  %2523 = vmatmul.mubr.bf16.vlgmr.msra.gmra.mxu0 %v4739_v56  ;;  %v5221_v48 = vrot.slane %v4438_v6, 4 }
 0x25e   : > { %2587 = vmatpush1.bf16.msra.mxu1 %v2936_v62  ;;  %v637_v19 = vpop.permute.xlu0 %636  ;;  %v1649_v57 = vsel %vm1646_vm7, %v4167_v29, %v1648_v39  ;;  %3035 = vmatprep.mubr.msk.bf16.mxu0 %vm2486_vm13, %v3213_v55  ;;  %v657_v51 = vsel %vm602_vm6, %v5220_v61, %v649_v46  ;;  %v1591_v29 = vpop.permute.xlu1 %1590  ;;  %vm5234_vm7 = vcmask 1039360  }
 0x25f   : > { %v646_v21 = vrot.slane %v637_v19, 4  ;;  %v3020_v38 = vcombine.low %v1649_v57, %v1653_v35  ;;  %v3021_v43 = vcombine.high %v1649_v57, %v1653_v35  ;;  %v658_v60 = vsel %vm651_vm5, %v4445_v25, %v657_v51 }
 0x260   : > { %v1597_v47 = vrot.slane %v1591_v29, 4  ;;  %v5222_v19 = vrot.slane %v4204_v52, 4  ;;  %v5223_v35 = vrot.slane %v4195_v44, 4  ;;  %v5225_v29 = vrot.slane %v4481_v12, 4 }
 0x261   : > { %v653_v62 = vsel %vm602_vm6, %v5221_v48, %v646_v21  ;;  %2619 = vmatprep.subr.bf16.mxu0 %v3021_v43  ;;  %v5224_v48 = vrot.slane %v4486_v17, 4 }
 0x262   : > { %2620 = vmatpush1.bf16.msra.mxu0 %v3020_v38  ;;  %v1585_v13 = vpop.permute.xlu0 %1584  ;;  %v654_v28 = vsel %vm651_vm5, %v4438_v6, %v653_v62  ;;  %v1605_v57 = vsel %vm602_vm6, %v5222_v19, %v1597_v47  ;;  %v595_v46 = vpop.permute.xlu1 %594  ;;  %v5226_v19 = vrot.slane %v4256_v36, 4  ;;  %vm5259_vm5 = vcmask 138240  }
 0x263   : > { %v1594_v59 = vrot.slane %v1585_v13, 4  ;;  %v2932_v39 = vcombine.low %v654_v28, %v658_v60  ;;  %v2933_v33 = vcombine.high %v654_v28, %v658_v60  ;;  %v1606_v25 = vsel %vm1599_vm9, %v4204_v52, %v1605_v57 }
 0x264   : > { %v601_v38 = vrot.slane %v595_v46, 4 }
 0x265   : > { %v1601_v55 = vsel %vm602_vm6, %v5223_v35, %v1594_v59  ;;  %2588 = vmatprep.subr.bf16.mxu1 %v2933_v33  ;;  %v5227_v35 = vrot.slane %v4249_v26, 4 }
 0x266   : > { %2589 = vmatpush1.bf16.msra.mxu1 %v2932_v39  ;;  %v589_v21 = vpop.permute.xlu0 %588  ;;  %v1602_v6 = vsel %vm1599_vm9, %v4195_v44, %v1601_v55  ;;  %v610_v62 = vsel %vm602_vm6, %v5224_v48, %v601_v38  ;;  %v1544_v28 = vpop.permute.xlu1 %1543  ;;  %v5229_v48 = vrot.slane %v4517_v14, 4  ;;  %vm5235_vm9 = vmmov %vm5234_vm7 }
 0x267   : > { %v598_v43 = vrot.slane %v589_v21, 4  ;;  %v3016_v61 = vcombine.low %v1602_v6, %v1606_v25  ;;  %v3017_v51 = vcombine.high %v1602_v6, %v1606_v25  ;;  %v611_v52 = vsel %vm604_vm4, %v4486_v17, %v610_v62 }
 0x268   : > { %v1550_v47 = vrot.slane %v1544_v28, 4 }
 0x269   : > { %v606_v13 = vsel %vm602_vm6, %v5225_v29, %v598_v43  ;;  %2621 = vmatprep.subr.bf16.mxu0 %v3017_v51 }
 0x26a   : > { %2622 = vmatpush1.bf16.msra.mxu0 %v3016_v61  ;;  %v1538_v60 = vpop.permute.xlu0 %1537  ;;  %v607_v44 = vsel %vm604_vm4, %v4481_v12, %v606_v13  ;;  %v1558_v57 = vsel %vm602_vm6, %v5226_v19, %v1550_v47  ;;  %v1262_v46 = vpop.permute.xlu1 %1261  ;;  %v5228_v61 = vrot.slane %v4522_v10, 4  ;;  %v5230_v47 = vrot.slane %v4301_v23, 4 }
 0x26b   : > { %v1547_v59 = vrot.slane %v1538_v60, 4  ;;  %v2928_v39 = vcombine.low %v607_v44, %v611_v52  ;;  %v2929_v33 = vcombine.high %v607_v44, %v611_v52  ;;  %v1559_v17 = vsel %vm1552_vm11, %v4256_v36, %v1558_v57 }
 0x26c   : > { %v1268_v6 = vrot.slane %v1262_v46, 4  ;;  %vm5253_vm4 = vcmask 965632  }
 0x26d   : > { %v1554_v55 = vsel %vm602_vm6, %v5227_v35, %v1547_v59  ;;  %2590 = vmatprep.subr.bf16.mxu1 %v2929_v33 }
 0x26e   : > { %2591 = vmatpush1.bf16.msra.mxu1 %v2928_v39  ;;  %v1256_v21 = vpop.permute.xlu0 %1255  ;;  %v1555_v12 = vsel %vm1552_vm11, %v4249_v26, %v1554_v55  ;;  %v1276_v51 = vsel %vm602_vm6, %v5228_v61, %v1268_v6  ;;  %v1497_v29 = vpop.permute.xlu1 %1496  ;;  %v5231_v39 = vrot.slane %v4293_v11, 4  ;;  %v5233_v6 = vrot.slane %v4553_v16, 4 }
 0x26f   : > { %v1265_v25 = vrot.slane %v1256_v21, 4  ;;  %v3012_v38 = vcombine.low %v1555_v12, %v1559_v17  ;;  %v3013_v43 = vcombine.high %v1555_v12, %v1559_v17  ;;  %v1277_v36 = vsel %vm1270_vm2, %v4522_v10, %v1276_v51 }
 0x270   : > { %v1503_v28 = vrot.slane %v1497_v29, 4  ;;  %v5232_v12 = vrot.slane %v4558_v18, 4  ;;  %v3212_v29 = vld [vmem:[#allocation2 + $0x10] ss:$24 sps:$4 sm:$0xff]   ;;  %vm5238_vm11 = vcmask 310272  }
 0x271   : > { %v1272_v62 = vsel %vm602_vm6, %v5229_v48, %v1265_v25  ;;  %2623 = vmatprep.subr.bf16.mxu0 %v3013_v43  ;;  %vm5239_vm13 = vmmov %vm5238_vm11 }
 0x272   : > { %2624 = vmatpush1.bf16.msra.mxu0 %v3012_v38  ;;  %v1491_v13 = vpop.permute.xlu0 %1490  ;;  %v1273_v26 = vsel %vm1270_vm2, %v4517_v14, %v1272_v62  ;;  %v1511_v59 = vsel %vm602_vm6, %v5230_v47, %v1503_v28  ;;  %v1215_v19 = vpop.permute.xlu1 %1214  ;;  %vm5247_vm2 = vcmask 957440  }
 0x273   : > { %v1500_v60 = vrot.slane %v1491_v13, 4  ;;  %v2988_v44 = vcombine.low %v1273_v26, %v1277_v36  ;;  %v2989_v52 = vcombine.high %v1273_v26, %v1277_v36  ;;  %v1512_v10 = vsel %vm1505_vm14, %v4301_v23, %v1511_v59  ;;  %vm5248_vm3 = vmmov %vm5247_vm2 }
 0x274   : > { %v1221_v35 = vrot.slane %v1215_v19, 4  ;;  %v5236_v13 = vrot.slane %v4341_v20, 4  ;;  %v5237_v36 = vrot.slane %v4336_v9, 4  ;;  %v5240_v19 = vrot.slane %v4383_v45, 4 }
 0x275   : > { %v1507_v33 = vsel %vm602_vm6, %v5231_v39, %v1500_v60  ;;  %2592 = vmatprep.subr.bf16.mxu1 %v2989_v52  ;;  %v3210_v52 = vld [vmem:[#allocation2 + $0xc] ss:$24 sps:$4 sm:$0xff]  }
 0x276   : > { %2593 = vmatpush2.bf16.msra.mxu1 %v2988_v44  ;;  %v1209_v57 = vpop.permute.xlu0 %1208  ;;  %v1508_v14 = vsel %vm1505_vm14, %v4293_v11, %v1507_v33  ;;  %v1229_v17 = vsel %vm602_vm6, %v5232_v12, %v1221_v35  ;;  %v1450_v38 = vpop.permute.xlu1 %1449  ;;  %vm5242_vm14 = vcmask 318464  }
 0x277   : > { %v1218_v55 = vrot.slane %v1209_v57, 4  ;;  %v3008_v46 = vcombine.low %v1508_v14, %v1512_v10  ;;  %v3009_v21 = vcombine.high %v1508_v14, %v1512_v10  ;;  %v1230_v23 = vsel %vm5235_vm9, %v4558_v18, %v1229_v17  ;;  %vm5243_vm1 = vmmov %vm5242_vm14 }
 0x278   : > { %v1456_v61 = vrot.slane %v1450_v38, 4  ;;  %v5241_v14 = vrot.slane %v4376_v22, 4 }
 0x279   : > { %v1225_v25 = vsel %vm602_vm6, %v5233_v6, %v1218_v55  ;;  %2625 = vmatprep.subr.bf16.mxu0 %v3009_v21 }
 0x27a   : > { %2626 = vmatpush1.bf16.msra.mxu0 %v3008_v46  ;;  %v1444_v43 = vpop.permute.xlu0 %1443  ;;  %v1226_v11 = vsel %vm5234_vm7, %v4553_v16, %v1225_v25  ;;  %v1464_v26 = vsel %vm602_vm6, %v5236_v13, %v1456_v61  ;;  %v1403_v60 = vpop.permute.xlu1 %1402  ;;  %v5244_v25 = vrot.slane %v4599_v53, 4  ;;  %vm5270_vm7 = vcmask 154624  }
 0x27b   : > { %v1453_v51 = vrot.slane %v1444_v43, 4  ;;  %v2984_v48 = vcombine.low %v1226_v11, %v1230_v23  ;;  %v2985_v62 = vcombine.high %v1226_v11, %v1230_v23  ;;  %v1465_v44 = vsel %vm5239_vm13, %v4341_v20, %v1464_v26 }
 0x27c   : > { %v1409_v47 = vrot.slane %v1403_v60, 4 }
 0x27d   : > { %v1460_v28 = vsel %vm602_vm6, %v5237_v36, %v1453_v51  ;;  %2594 = vmatprep.subr.bf16.mxu1 %v2985_v62 }
 0x27e   : > { %2595 = vmatpush2.bf16.msra.mxu1 %v2984_v48  ;;  %v1397_v16 = vpop.permute.xlu0 %1396  ;;  %v1461_v18 = vsel %vm5238_vm11, %v4336_v9, %v1460_v28  ;;  %v1417_v57 = vsel %vm602_vm6, %v5240_v19, %v1409_v47  ;;  %v1160_v35 = vpop.permute.xlu1 %1159  ;;  %v5250_v47 = vrot.slane %v4631_v1, 4 }
 0x27f   : > { %v1406_v59 = vrot.slane %v1397_v16, 4  ;;  %v3004_v39 = vcombine.low %v1461_v18, %v1465_v44  ;;  %v3005_v33 = vcombine.high %v1461_v18, %v1465_v44  ;;  %2596 = vmatprep.subr.bf16.mxu1 %v3212_v29  ;;  %v1418_v55 = vsel %vm5243_vm1, %v4383_v45, %v1417_v57 }
 0x280   : > { %v1166_v46 = vrot.slane %v1160_v35, 4  ;;  %v5246_v29 = vrot.slane %v4418_v0, 4  ;;  %v5249_v44 = vrot.slane %v4640_v41, 4  ;;  %v5251_v35 = vrot.slane %v4468_v27, 4 }
 0x281   : > { %v1413_v10 = vsel %vm602_vm6, %v5241_v14, %v1406_v59  ;;  %2627 = vmatprep.subr.bf16.mxu0 %v3005_v33 }
 0x282   : > { %2628 = vmatpush1.bf16.msra.mxu0 %v3004_v39  ;;  %v1154_v9 = vpop.permute.xlu0 %1153  ;;  %v1414_v20 = vsel %vm5242_vm14, %v4376_v22, %v1413_v10  ;;  %2597 = vmatpush2.bf16.msra.mxu1 %v3210_v52  ;;  %v1174_v6 = vsel %vm602_vm6, %v1165_v3, %v1166_v46  ;;  %v1356_v43 = vpop.permute.xlu1 %1355  ;;  %v5245_v3 = vrot.slane %v4425_v4, 4 }
 0x283   : > { %v1163_v21 = vrot.slane %v1154_v9, 4  ;;  %v3000_v12 = vcombine.low %v1414_v20, %v1418_v55  ;;  %v3001_v17 = vcombine.high %v1414_v20, %v1418_v55  ;;  %v1175_v11 = vsel %vm1168_vm8, %v4609_v8, %v1174_v6 }
 0x284   : > { %v1362_v23 = vrot.slane %v1356_v43, 4  ;;  %v5252_v20 = vrot.slane %v4462_v63, 4 }
 0x285   : > { %v1170_v38 = vsel %vm602_vm6, %v5244_v25, %v1163_v21  ;;  %2629 = vmatprep.subr.bf16.mxu0 %v3001_v17 }
 0x286   : > { %2630 = vmatpush1.bf16.msra.mxu0 %v3000_v12  ;;  %v1350_v22 = vpop.permute.xlu0 %1349  ;;  %v1171_v45 = vsel %vm1168_vm8, %v4599_v53, %v1170_v38  ;;  %v1370_v62 = vsel %vm602_vm6, %v5245_v3, %v1362_v23  ;;  %v1113_v26 = vpop.permute.xlu1 %1112  ;;  %v5255_v38 = vrot.slane %v4674_v40, 4  ;;  %vm5260_vm8 = vmmov %vm5259_vm5 }
 0x287   : > { %v1359_v61 = vrot.slane %v1350_v22, 4  ;;  %v2976_v51 = vcombine.low %v1171_v45, %v1175_v11  ;;  %v2977_v48 = vcombine.high %v1171_v45, %v1175_v11  ;;  %v1371_v8 = vsel %vm5248_vm3, %v4425_v4, %v1370_v62 }
 0x288   : > { %v1119_v28 = vrot.slane %v1113_v26, 4  ;;  %v5256_v22 = vrot.slane %v4667_v42, 4  ;;  %v5257_v62 = vrot.slane %v4504_v50, 4 }
 0x289   : > { %v1366_v13 = vsel %vm602_vm6, %v5246_v29, %v1359_v61  ;;  %2598 = vmatprep.subr.bf16.mxu1 %v2977_v48 }
 0x28a   : > { %2599 = vmatpush2.bf16.msra.mxu1 %v2976_v51  ;;  %v1107_v36 = vpop.permute.xlu0 %1106  ;;  %v1367_v53 = vsel %vm5247_vm2, %v4418_v0, %v1366_v13  ;;  %v1127_v52 = vsel %vm602_vm6, %v5249_v44, %v1119_v28  ;;  %v1309_v39 = vpop.permute.xlu1 %1308  ;;  %v5258_v13 = vrot.slane %v4499_v24, 4 }
 0x28b   : > { %v1116_v60 = vrot.slane %v1107_v36, 4  ;;  %v2996_v16 = vcombine.low %v1367_v53, %v1371_v8  ;;  %v2997_v18 = vcombine.high %v1367_v53, %v1371_v8  ;;  %v1128_v4 = vsel %vm1121_vm0, %v4640_v41, %v1127_v52 }
 0x28c   : > { %v1315_v19 = vrot.slane %v1309_v39, 4  ;;  %v5262_v52 = vrot.slane %v4691_v58, 4 }
 0x28d   : > { %v1123_v59 = vsel %vm602_vm6, %v5250_v47, %v1116_v60  ;;  %2631 = vmatprep.subr.bf16.mxu0 %v2997_v18  ;;  %v5261_v18 = vrot.slane %v4698_v49, 4 }
 0x28e   : > { %2632 = vmatpush1.bf16.msra.mxu0 %v2996_v16  ;;  %v1303_v33 = vpop.permute.xlu0 %1302  ;;  %v1124_v0 = vsel %vm1121_vm0, %v4631_v1, %v1123_v59  ;;  %v1323_v9 = vsel %vm602_vm6, %v5251_v35, %v1315_v19  ;;  %v1066_v46 = vpop.permute.xlu1 %1065  ;;  %vm5254_vm0 = vmmov %vm5253_vm4 }
 0x28f   : > { %v1312_v57 = vrot.slane %v1303_v33, 4  ;;  %v2972_v14 = vcombine.low %v1124_v0, %v1128_v4  ;;  %v2973_v10 = vcombine.high %v1124_v0, %v1128_v4  ;;  %v1324_v41 = vsel %vm5254_vm0, %v4468_v27, %v1323_v9 }
 0x290   : > { %v1072_v12 = vrot.slane %v1066_v46, 4 }
 0x291   : > { %v1319_v55 = vsel %vm602_vm6, %v5252_v20, %v1312_v57  ;;  %2600 = vmatprep.subr.bf16.mxu1 %v2973_v10  ;;  %v5263_v57 = vrot.slane %v4540_v34, 4  ;;  %v5264_v10 = vrot.slane %v4535_v31, 4 }
 0x292   : > { %2601 = vmatpush2.bf16.msra.mxu1 %v2972_v14  ;;  %v1060_v21 = vpop.permute.xlu0 %1059  ;;  %v1320_v1 = vsel %vm5253_vm4, %v4462_v63, %v1319_v55  ;;  %v1080_v43 = vsel %vm602_vm6, %v5255_v38, %v1072_v12  ;;  %v1779_v11 = vpop.permute.xlu1 %1778  ;;  %v5267_v12 = vrot.slane %v4715_v15, 4 }
 0x293   : > { %v1069_v17 = vrot.slane %v1060_v21, 4  ;;  %v2992_v6 = vcombine.low %v1320_v1, %v1324_v41  ;;  %v2993_v25 = vcombine.high %v1320_v1, %v1324_v41  ;;  %v1081_v27 = vsel %vm1074_vm10, %v4674_v40, %v1080_v43 }
 0x294   : > { %v1785_v61 = vrot.slane %v1779_v11, 4 }
 0x295   : > { %v1076_v45 = vsel %vm602_vm6, %v5256_v22, %v1069_v17  ;;  %2633 = vmatprep.subr.bf16.mxu0 %v2993_v25 }
 0x296   : > { %2634 = vmatpush1.bf16.msra.mxu0 %v2992_v6  ;;  %v1773_v23 = vpop.permute.xlu0 %1772  ;;  %v1077_v63 = vsel %vm1074_vm10, %v4667_v42, %v1076_v45  ;;  %v1793_v29 = vsel %vm602_vm6, %v5257_v62, %v1785_v61  ;;  %v1019_v36 = vpop.permute.xlu1 %1018  ;;  %vm5265_vm10 = vcmask 146432  }
 0x297   : > { %v1782_v51 = vrot.slane %v1773_v23, 4  ;;  %v2968_v48 = vcombine.low %v1077_v63, %v1081_v27  ;;  %v2969_v3 = vcombine.high %v1077_v63, %v1081_v27  ;;  %v1794_v40 = vsel %vm5260_vm8, %v4504_v50, %v1793_v29 }
 0x298   : > { %v1025_v8 = vrot.slane %v1019_v36, 4  ;;  %v5269_v23 = vrot.slane %v4571_v32, 4  ;;  %v2670_v29 = vsub.s32 1, %v3999_v2 }
 0x299   : > { %v1789_v26 = vsel %vm602_vm6, %v5258_v13, %v1782_v51  ;;  %2602 = vmatprep.subr.bf16.mxu1 %v2969_v3  ;;  %v2662_v3 = vld [vmem:[%s3979_s1] sm:$0xf]  ;;  %s4953_s1 = scalar_lea.vmem [#allocation15], %s2920_s20 }
 0x29a   : > { %2603 = vmatpush2.bf16.msra.mxu1 %v2968_v48  ;;  %v1013_v53 = vpop.permute.xlu0 %1012  ;;  %v1790_v42 = vsel %vm5259_vm5, %v4499_v24, %v1789_v26  ;;  %v1033_v44 = vsel %vm602_vm6, %v5261_v18, %v1025_v8  ;;  %v1732_v59 = vpop.permute.xlu1 %1731  ;;  %s2715_s0 = sshll.u32 %s4953_s1, 4  ;;  %s4969_s0 = int_to_ptr.vmem [resolvable:$true] %s2715_s0 }
 0x29b   : > { %v1022_v28 = vrot.slane %v1013_v53, 4  ;;  %v3032_v60 = vcombine.low %v1790_v42, %v1794_v40  ;;  %v3033_v16 = vcombine.high %v1790_v42, %v1794_v40  ;;  %v1034_v50 = vsel %vm1027_vm12, %v4698_v49, %v1033_v44  ;;  %s3384_s7 = scalar_lea.vmem %s4969_s0, 1024  ;;  %p3391_p10 = scmp.lt.s32.totalorder %s4969_s0, %s3389_s11 }
 0x29c   : > { %v1738_v33 = vrot.slane %v1732_v59, 4  ;;  %v2671_v40 = vrot.slane %v2662_v3, %v2670_v29  ;;  %p3385_p12 = scmp.ne.s32.totalorder %s4969_s0, %s3384_s7  ;;  %p3392_p1 = scmp.lt.s32.totalorder %s3390_s27, %s3384_s7 }
 0x29d   : > { %v1029_v47 = vsel %vm602_vm6, %v5262_v52, %v1022_v28  ;;  %2645 = vmatprep.subr.bf16.mxu0 %v3033_v16 }
 0x29e   : > { %2646 = vmatpush2.bf16.msra.mxu0 %v3032_v60  ;;  %v1726_v39 = vpop.permute.xlu0 %1725  ;;  %v1030_v24 = vsel %vm1027_vm12, %v4691_v58, %v1029_v47  ;;  %v1746_v14 = vsel %vm602_vm6, %v5263_v57, %v1738_v33  ;;  %v972_v9 = vpop.permute.xlu1 %971  ;;  %vm5266_vm12 = vmmov %vm5265_vm10  ;;  %p3386_p13 = pnand %p3385_p12, %p5274_p6  ;;  %p3393_p2 = por %p3392_p1, %p3391_p10 }
 0x29f   : > { %v1735_v0 = vrot.slane %v1726_v39, 4  ;;  %v2964_v4 = vcombine.low %v1030_v24, %v1034_v50  ;;  %v2965_v19 = vcombine.high %v1030_v24, %v1034_v50  ;;  %v1747_v49 = vsel %vm5266_vm12, %v4540_v34, %v1746_v14 }
 0x2a0   : > { %v978_v55 = vrot.slane %v972_v9, 4  ;;  %v2674_v24 = vsub.s32 2, %v3999_v2  ;;  %p3387_p8 = pneg %p3386_p13 }
 0x2a1   : > { %v1742_v35 = vsel %vm602_vm6, %v5264_v10, %v1735_v0  ;;  %2604 = vmatprep.subr.bf16.mxu1 %v2965_v19  ;;  %v2678_v0 = vsub.s32 3, %v3999_v2 }
 0x2a2   : > { %2605 = vmatpush2.bf16.msra.mxu1 %v2964_v4  ;;  %v966_v20 = vpop.permute.xlu0 %965  ;;  %v1743_v58 = vsel %vm5265_vm10, %v4535_v31, %v1742_v35  ;;  %v986_v41 = vsel %vm602_vm6, %v977_v37, %v978_v55  ;;  %v1685_v6 = vpop.permute.xlu1 %1684  ;;  %v5268_v37 = vrot.slane %v4576_v5, 4  ;;  %v2675_v19 = vrot.slane %v2662_v3, %v2674_v24  ;;  %p3394_p0 = pnand %p3393_p2, %p3387_p8 }
 0x2a3   : > { %v975_v46 = vrot.slane %v966_v20, 4  ;;  %v3028_v21 = vcombine.low %v1743_v58, %v1747_v49  ;;  %v3029_v1 = vcombine.high %v1743_v58, %v1747_v49  ;;  %v987_v34 = vsel %vm980_vm15, %v4722_v30, %v986_v41 }
 0x2a4   : > { %v1691_v38 = vrot.slane %v1685_v6, 4  ;;  %v2679_v9 = vrot.slane %v2662_v3, %v2678_v0 }
 0x2a5   : > { %v982_v17 = vsel %vm602_vm6, %v5267_v12, %v975_v46  ;;  %2647 = vmatprep.subr.bf16.mxu0 %v3029_v1 }
 0x2a6   : > { %2648 = vmatpush2.bf16.msra.mxu0 %v3028_v21  ;;  %v1679_v25 = vpop.permute.xlu0 %1678  ;;  %v983_v31 = vsel %vm980_vm15, %v4715_v15, %v982_v17  ;;  %v1699_v11 = vsel %vm602_vm6, %v5268_v37, %v1691_v38  ;;  %vm5271_vm15 = vmmov %vm5270_vm7 }
 0x2a7   : > { %v1688_v43 = vrot.slane %v1679_v25, 4  ;;  %v2960_v22 = vcombine.low %v983_v31, %v987_v34  ;;  %v2961_v45 = vcombine.high %v983_v31, %v987_v34  ;;  %v1700_v30 = vsel %vm5271_vm15, %v4576_v5, %v1699_v11 }
 0x2a9   : > { %v1695_v63 = vsel %vm602_vm6, %v5269_v23, %v1688_v43  ;;  %2606 = vmatprep.subr.bf16.mxu1 %v2961_v45 }
 0x2aa   : > { %2607 = vmatpush2.bf16.msra.mxu1 %v2960_v22  ;;  %v1696_v15 = vsel %vm5270_vm7, %v4571_v32, %v1695_v63  ;;  %v2667_v32 = vrot.slane %v2662_v3, %v4024_v7 }
 0x2ab   : > { %v3024_v27 = vcombine.low %v1696_v15, %v1700_v30  ;;  %v3025_v61 = vcombine.high %v1696_v15, %v1700_v30 }
 0x2ad   : > { %2609 = vmatmul.mubr.bf16.vlgmr.msra.gmra.mxu1 %v4739_v56  ;;  %2649 = vmatprep.subr.bf16.mxu0 %v3025_v61 }
 0x2ae   : > { %2650 = vmatpush2.bf16.msra.mxu0 %v3024_v27 }
 0x2af   : > { %v1925_v26 = vpop.permute.xlu1 %1924 }
 0x2b1   : > { %2652 = vmatmul.mubr.bf16.vlgmr.msra.gmra.mxu0 %v4597_v54 }
 0x2b3   : > { %v1920_v62 = vpop.permute.xlu0 %1919 }
 0x2e1   : > { %v2567_v51 = vpop.f32.mrf.mxu1 }
 0x2e3   : > { %v2569_v48 = vpop.f32.mrf.mxu1 }
 0x2e5   : > { %v2571_v53 = vpop.f32.mrf.mxu1 }
 0x2e7   : > { %v2573_v18 = vpop.f32.mrf.mxu1 }
 0x31d   : > { %v2524_v13 = vpop.f32.mrf.mxu0 }
 0x31e   : > { %v2525_v5 = vadd.f32 %v2524_v13, %v1920_v62 }
 0x31f   : > { %v2526_v36 = vpop.f32.mrf.mxu0 }
 0x320   : > { %v2527_v42 = vadd.f32 %v2526_v36, %v1920_v62  ;;  %v2568_v56 = vadd.f32 %v2567_v51, %v2525_v5 }
 0x321   : > { %v2528_v8 = vpop.f32.mrf.mxu0 }
 0x322   : > { %v2529_v28 = vadd.f32 %v2528_v8, %v1925_v26  ;;  %v2570_v54 = vadd.f32 %v2569_v48, %v2527_v42  ;;  %v2684_v60 = vmul.f32 %v2667_v32, %v2568_v56 }
 0x323   : > { %v2530_v16 = vpop.f32.mrf.mxu0 }
 0x324   : > { %v2531_v44 = vadd.f32 %v2530_v16, %v1925_v26  ;;  %v2572_v52 = vadd.f32 %v2571_v53, %v2529_v28  ;;  %2692 = vst [vmem:[%s4953_s1] sm:$0xff] %v2684_v60  ;;  %v2685_v7 = vmul.f32 %v2671_v40, %v2570_v54 }
 0x326   : > { %v2688_v47 = vmul.f32 %v2667_v32, %v2572_v52  ;;  %v2574_v59 = vadd.f32 %v2573_v18, %v2531_v44  ;;  %2693 = vst [vmem:[%s4953_s1 + $0x8] sm:$0xff] %v2685_v7 }
 0x328   : > { %2696 = vst [vmem:[%s4953_s1 + $0x20] sm:$0xff] %v2688_v47  ;;  %v2689_v39 = vmul.f32 %v2671_v40, %v2574_v59 }
 0x32a   : > { %2697 = vst [vmem:[%s4953_s1 + $0x28] sm:$0xff] %v2689_v39 }
 0x36d   : > { %v2610_v50 = vpop.f32.mrf.mxu1 }
 0x36e   : > { %v2611_v33 = vadd.f32 %v2610_v50, %v1920_v62 }
 0x36f   : > { %v2612_v4 = vpop.f32.mrf.mxu1 }
 0x370   : > { %v2613_v10 = vadd.f32 %v2612_v4, %v1920_v62 }
 0x371   : > { %v2614_v57 = vpop.f32.mrf.mxu1  ;;  %v2653_v14 = vpop.f32.mrf.mxu0 }
 0x372   : > { %v2654_v35 = vadd.f32 %v2653_v14, %v2611_v33  ;;  %v2615_v49 = vadd.f32 %v2614_v57, %v1925_v26 }
 0x373   : > { %v2616_v20 = vpop.f32.mrf.mxu1  ;;  %v2655_v58 = vpop.f32.mrf.mxu0 }
 0x374   : > { %v2686_v55 = vmul.f32 %v2675_v19, %v2654_v35  ;;  %v2656_v46 = vadd.f32 %v2655_v58, %v2613_v10  ;;  %v2617_v21 = vadd.f32 %v2616_v20, %v1925_v26 }
 0x375   : > { %v2657_v2 = vpop.f32.mrf.mxu0 }
 0x376   : > { %2694 = vst [vmem:[%s4953_s1 + $0x10] sm:$0xff] %v2686_v55  ;;  %v2687_v1 = vmul.f32 %v2679_v9, %v2656_v46  ;;  %v2658_v41 = vadd.f32 %v2657_v2, %v2615_v49 }
 0x377   : > { %v2659_v12 = vpop.f32.mrf.mxu0 }
 0x378   : > { %2695 = vst [vmem:[%s4953_s1 + $0x18] sm:$0xff] %v2687_v1  ;;  %v2690_v17 = vmul.f32 %v2675_v19, %v2658_v41  ;;  %v2660_v6 = vadd.f32 %v2659_v12, %v2617_v21 }
 0x37a   : > { %2698 = vst [vmem:[%s4953_s1 + $0x30] sm:$0xff] %v2690_v17  ;;  %v2691_v25 = vmul.f32 %v2679_v9, %v2660_v6 }
 0x37c   : > { %2699 = vst [vmem:[%s4953_s1 + $0x38] sm:$0xff] %v2691_v25 }
 0x37d   : > { %3397 = shalt.err (!%p3394_p0)
}
 0x37e   : > { %s3410_s4 = scalar_lea.hbm %s4967_s6, 1536  ;;  %s3402_s2 = scalar_lea.hbm %s5273_s22, 4096 }
 0x37f   : > { %p3399_p9 = scmp.ne.s32.totalorder %s4973_s13, %s3410_s4  ;;  %p3403_p7 = scmp.lt.s32.totalorder %s4973_s13, %s5273_s22 }
 0x380   : > { %p3404_p11 = scmp.lt.s32.totalorder %s3402_s2, %s3410_s4 }
 0x381   : > { %p3400_p5 = pnand %p3399_p9, %p5274_p6 }
 0x382   : > { %p3405_p4 = por %p3404_p11, %p3403_p7 }
 0x383   : > { %p3401_p3 = pneg %p3400_p5 }
 0x385   : > { %p3406_p12 = pnand %p3405_p4, %p3401_p3 }
 0x387   : > { %3409 = shalt.err (!%p3406_p12)
}
 0x388   : > { %s3556_s18 = smov 512   ;;  %s3557_s20 = smov 2048  }
 0x389   : > { %s3558_s1 = smov 32  }
 0x38a   : > { %3055 = dma.vmem_to_hbm [thread:$0]  (%p5274_p6), %s4969_s0, 1024, %s4973_s13, %s2701_s3, %s3556_s18, %s3557_s20, %s3558_s1  }
 0x38b PF: > { %s5275_s23 = sld [smem:[#allocation24_spill]]  ;;  %p5278_p8 = scmp.ge.s32.totalorder %s3517_s14, 2 }
 0x38c   : > { %s5276_s15 = sld [smem:[#allocation30_spill]] }
 0x391   : > { %s2730_s17 = sand.u32 1, %s5275_s23  }
 0x392   : > { %p5277_p13 = scmp.ne.s32.totalorder %s5276_s15, 0  ;;  %s2731_s6 = scalar_lea.sflag [#allocation6], %s2730_s17 }
 0x394   : > { %p3078_p10 = pnand %p5278_p8, %p5277_p13 }
 0x396   : > { %p3079_p1 = pneg %p3078_p10 }
 0x398   : > { %3476 = dma.done.wait (%p3079_p1), %s2731_s6, 1024  }
 0x399   : > { %3478 = vsyncadd (%p3079_p1), %s2731_s6, 4294966272  ;;  %s5279_s7 = sld [smem:[#allocation23_spill]]  ;;  %p28_p6 = scmp.ge.s32.totalorder %s3656_s16, 4  }
 0x39a   : > { %s5280_s12 = sld [smem:[#allocation25_spill]]  ;;  %s5285_s27 = smov %s3485_s28 }
 0x39b   : > { %s5281_s10 = sld [smem:[#allocation29_spill]]  ;;  %s5287_s29 = smov %s5293_s21 }
 0x39c   : > { %s5282_s11 = sld [smem:[#allocation27_spill]]  ;;  %s5288_s30 = smov %s3497_s9 }
 0x39d   : > { %s5283_s24 = sld [smem:[#allocation28_spill]]  ;;  %s5291_s14 = smov %s3656_s16 }
 0x39e   : > { %s5284_s13 = sld [smem:[#allocation35_spill]] }
 0x39f   : > { %s5286_s28 = smov %s5279_s7  ;;  %30 = sbr.rel (!%p28_p6) target bundleno = 22 (0x16), region = 152 }
 0x3a0   : > { %s5289_s9 = smov %s5280_s12 }
 0x3a3   : > { %s5290_s12 = smov %s5283_s24 }
 0x3a4   :  { %2736 = vsyncpa [#allocation5], 1 }
 0x3a5   :  { %2738 = vsyncpa [#allocation5 + $0x1], 1 }
 0x3a6   :  { %2739 = vsyncpa [#allocation8], 1 }
 0x3a7   :  { %2741 = vsyncpa [#allocation8 + $0x1], 1 }
 0x3a8   :  { %2742 = vsyncpa [#allocation11], 1 }
 0x3a9   :  { %2744 = vsyncpa [#allocation11 + $0x1], 1 }
 0x3aa   :  { %2745 = vsyncpa [#allocation14], 1 }
 0x3ab   :  { %2746 = vsyncpa [#allocation6], 1 }
 0x3ac   :  { %2748 = vsyncpa [#allocation6 + $0x1], 1 }

</bundles_post_ra>
